<compile_context>
chip_gen: v7x
topology: tpu7x:2x2x1
jax: 0.10.0
libtpu: 0.0.40
codegen_flags: <defaults>
</compile_context>

<pallas_src>
import functools

import numpy as np
import jax
import jax.numpy as jnp
from jax import lax
from jax.experimental import pallas as pl
from jax.experimental.pallas import tpu as pltpu


# ------------------------------- Pallas kernel ------------------------------ #

def _inject_kernel(xl_ref, xg_ref, wl_ref, bl_ref, wg_ref, bg_ref,
                   rh_ref, rwt_ref, out_ref,
                   g3_ref, sig_ref, feat_ref,
                   *, oup, H, W, gH, gW, t, apply_hsig):
    """Fused InjectionMultiSum forward.

    xl_ref : (cl, t)        local features, flat pixels on lanes (NCHW-native)
    xg_ref : (cg, gH*gW)    sliced global features for this batch
    wl_ref : (oup, cl)      fused local_embedding conv+BN
    bl_ref : (oup, 1)
    wg_ref : (2*oup, cg)    fused [global_act ; global_embedding] conv+BN
    bg_ref : (2*oup, 1)
    rh_ref : (H, gH)        per-axis resize matrix (rows)
    rwt_ref: (gW, W)        per-axis resize matrix (cols), transposed
    out_ref: (oup, t)
    g3_ref : VMEM (2*oup, gH, gW)      scratch: conv output as rows
    sig_ref: VMEM (n_tiles, oup, t)    scratch: resized sig_act (per tile, flat)
    feat_ref:VMEM (n_tiles, oup, t)    scratch: resized global_feat
    """
    i = pl.program_id(1)

    # ---- once per batch: global conv (+h_sigmoid) + separable resize ------- #
    @pl.when(i == 0)
    def _global_branch():
        # fused (act | embed) 1x1 conv on the small global map  -> (2*oup, gS)
        g = jnp.dot(wg_ref[...], xg_ref[...],
                    preferred_element_type=jnp.float32) + bg_ref[...]
        if apply_hsig:
            # h_sigmoid only on the act half (rows < oup), before interpolation
            rows = lax.broadcasted_iota(jnp.int32, g.shape, 0)
            hs = jnp.clip(g + 3.0, 0.0, 6.0) * (1.0 / 6.0)
            g = jnp.where(rows < oup, hs, g)

        # split flat gH*gW lanes into rows (small, once per batch)
        for r in range(gH):
            g3_ref[:, r, :] = g[:, r * gW:(r + 1) * gW]
        g3 = g3_ref[...]                                        # (2*oup, gH, gW)

        # separable resize, channel-batched on the MXU
        rh_b = jnp.broadcast_to(rh_ref[...][None, :, :], (2 * oup, H, gH))
        u = jnp.einsum('chg,cgv->chv', rh_b, g3,
                       preferred_element_type=jnp.float32)      # (2*oup, H, gW)
        rw_b = jnp.broadcast_to(rwt_ref[...][None, :, :], (2 * oup, gW, W))
        v = jnp.einsum('chv,cvw->chw', u, rw_b,
                       preferred_element_type=jnp.float32)      # (2*oup, H, W)

        # scatter rows into per-tile, flat-pixel (lane-dense) scratch
        for h in range(H):
            tile, off = (h * W) // t, (h * W) % t
            sig_ref[tile, :, off:off + W] = v[:oup, h, :]
            feat_ref[tile, :, off:off + W] = v[oup:, h, :]

    # ---- every tile: local 1x1 conv + multiply-add (lane-dense output) ----- #
    local = jnp.dot(wl_ref[...], xl_ref[...],
                    preferred_element_type=jnp.float32) + bl_ref[...]
    out_ref[...] = (local * sig_ref[i] + feat_ref[i]).astype(out_ref.dtype)


# ------------------------------ pallas wrapper ------------------------------ #

def _pick_rows(H, W, max_pixels):
    """Largest th with th | H, th*W <= max_pixels and (th*W) % 128 == 0 (or full)."""
    best = None
    for th in range(1, H + 1):
        if H % th:
            continue
        t = th * W
        if t > max_pixels:
            continue
        if t % 128 == 0 or t == H * W:
            best = th
    return best if best is not None else H


def _bilinear_matrix(dst, src):
    """F.interpolate bilinear, align_corners=False, as a (dst, src) matrix."""
    scale = src / dst
    m = np.zeros((dst, src), dtype=np.float32)
    for i in range(dst):
        s = max((i + 0.5) * scale - 0.5, 0.0)
        i0 = min(int(np.floor(s)), src - 1)
        i1 = min(i0 + 1, src - 1)
        lam = s - i0
        m[i, i0] += 1.0 - lam
        m[i, i1] += lam
    return m


def _adaptive_pool_matrix(dst, src):
    """adaptive_avg_pool2d (per-axis) as a (dst, src) averaging matrix."""
    m = np.zeros((dst, src), dtype=np.float32)
    for i in range(dst):
        a = (i * src) // dst
        b = -(-((i + 1) * src) // dst)  # ceil
        m[i, a:b] = 1.0 / (b - a)
    return m


def injection_forward(x_l, x_g, params, global_inp, flag, max_tile=2048):
    B, cl, H, W = x_l.shape
    _, _, gH, gW = x_g.shape
    use_pool = H < gH                                   # static, shape-dependent
    off = int(sum(global_inp[:flag]))
    cg = int(global_inp[flag])
    oup = int(params["bl"].shape[0])
    HW, gS = H * W, gH * gW

    # small channel slice of the global tensor + free spatial flatten (NCHW kept)
    g_info = lax.slice_in_dim(x_g, off, off + cg, axis=1).reshape(B, cg, gS)
    xl = x_l.reshape(B, cl, HW)

    # tiny per-axis resize matrices (host-precomputed constants)
    if use_pool:
        rh_np, rw_np = _adaptive_pool_matrix(H, gH), _adaptive_pool_matrix(W, gW)
    else:
        rh_np, rw_np = _bilinear_matrix(H, gH), _bilinear_matrix(W, gW)
    rh = jnp.asarray(rh_np)          # (H, gH)
    rwt = jnp.asarray(rw_np.T)       # (gW, W)

    th = _pick_rows(H, W, max_tile)
    t = th * W
    n_tiles = HW // t

    kernel = functools.partial(_inject_kernel, oup=oup, H=H, W=W, gH=gH, gW=gW,
                               t=t, apply_hsig=not use_pool)

    out = pl.pallas_call(
        kernel,
        out_shape=jax.ShapeDtypeStruct((B, oup, HW), x_l.dtype),
        grid_spec=pltpu.PrefetchScalarGridSpec(
            num_scalar_prefetch=0,
            grid=(B, n_tiles),
            in_specs=[
                pl.BlockSpec((None, cl, t), lambda b, i: (b, 0, i)),    # x_l
                pl.BlockSpec((None, cg, gS), lambda b, i: (b, 0, 0)),   # global info
                pl.BlockSpec((oup, cl), lambda b, i: (0, 0)),           # Wl
                pl.BlockSpec((oup, 1), lambda b, i: (0, 0)),            # bl
                pl.BlockSpec((2 * oup, cg), lambda b, i: (0, 0)),       # Wg (act|emb)
                pl.BlockSpec((2 * oup, 1), lambda b, i: (0, 0)),        # bg
                pl.BlockSpec((H, gH), lambda b, i: (0, 0)),             # Rh
                pl.BlockSpec((gW, W), lambda b, i: (0, 0)),             # Rw^T
            ],
            out_specs=pl.BlockSpec((None, oup, t), lambda b, i: (b, 0, i)),
            scratch_shapes=[
                pltpu.VMEM((2 * oup, gH, gW), jnp.float32),
                pltpu.VMEM((n_tiles, oup, t), jnp.float32),
                pltpu.VMEM((n_tiles, oup, t), jnp.float32),
            ],
        ),
        compiler_params=pltpu.CompilerParams(
            dimension_semantics=("parallel", "arbitrary"),
            vmem_limit_bytes=48 * 1024 * 1024,
        ),
    )(xl, g_info, params["wl"], params["bl"].reshape(oup, 1),
      params["wg"], params["bg"].reshape(2 * oup, 1), rh, rwt)

    return out.reshape(B, oup, H, W)


# ------------------------- deterministic parameters ------------------------- #

def _fuse_conv_bn(key, cin, cout, k, eps=1e-5):
    """Synthesize Conv2d weight + BatchNorm2d params and fold BN (eval) into conv."""
    kw, kg, kb, km, kv = jax.random.split(key, 5)
    w = 0.2 * jax.random.normal(kw, (cout, cin, k, k), jnp.float32)   # OIHW
    gamma = 1.0 + 0.1 * jax.random.normal(kg, (cout,), jnp.float32)
    beta = 0.1 * jax.random.normal(kb, (cout,), jnp.float32)
    mean = 0.1 * jax.random.normal(km, (cout,), jnp.float32)
    var = jax.random.uniform(kv, (cout,), jnp.float32, minval=0.5, maxval=1.5)
    scale = gamma / jnp.sqrt(var + eps)
    return w * scale[:, None, None, None], beta - mean * scale


def init_params(key, inp, oup, cg):
    k1, k2, k3 = jax.random.split(key, 3)
    wl, bl = _fuse_conv_bn(k1, inp, oup, 1)   # local_embedding
    wa, ba = _fuse_conv_bn(k2, cg, oup, 1)    # global_act
    we, be = _fuse_conv_bn(k3, cg, oup, 1)    # global_embedding
    return dict(
        wl_oihw=wl, bl=bl, wa_oihw=wa, ba=ba, we_oihw=we, be=be,
        wl=wl[:, :, 0, 0],                                               # (oup, inp)
        wg=jnp.concatenate([wa[:, :, 0, 0], we[:, :, 0, 0]], axis=0),    # (2*oup, cg)
        bg=jnp.concatenate([ba, be]),                                    # (2*oup,)
    )


# ------------------------------- plain-JAX ref ------------------------------- #

def _conv_ref(x, w, b):
    y = lax.conv_general_dilated(x, w, (1, 1), [(0, 0), (0, 0)],
                                 dimension_numbers=("NCHW", "OIHW", "NCHW"))
    return y + b[None, :, None, None]


def _hsig(x):
    return jnp.clip(x + 3.0, 0.0, 6.0) / 6.0


def _bilinear_ref(x, H, W):
    _, _, sh, sw = x.shape
    def grid(dst, src):
        s = jnp.maximum((jnp.arange(dst, dtype=jnp.float32) + 0.5) * (src / dst) - 0.5, 0.0)
        i0 = jnp.clip(jnp.floor(s).astype(jnp.int32), 0, src - 1)
        i1 = jnp.minimum(i0 + 1, src - 1)
        return i0, i1, s - i0.astype(jnp.float32)
    h0, h1, lh = grid(H, sh)
    w0, w1, lw = grid(W, sw)
    top = (x[:, :, h0, :] * (1.0 - lh)[None, None, :, None]
           + x[:, :, h1, :] * lh[None, None, :, None])
    return (top[:, :, :, w0] * (1.0 - lw)[None, None, None, :]
            + top[:, :, :, w1] * lw[None, None, None, :])


def _adaptive_pool_ref(x, H, W):
    _, _, sh, sw = x.shape
    rows = []
    for i in range(H):
        a = (i * sh) // H
        b = -(-((i + 1) * sh) // H)
        rows.append(jnp.mean(x[:, :, a:b, :], axis=2, keepdims=True))
    xr = jnp.concatenate(rows, axis=2)
    cols = []
    for j in range(W):
        a = (j * sw) // W
        b = -(-((j + 1) * sw) // W)
        cols.append(jnp.mean(xr[:, :, :, a:b], axis=3, keepdims=True))
    return jnp.concatenate(cols, axis=3)


def injection_ref(x_l, x_g, params, global_inp, flag):
    _, _, H, W = x_l.shape
    _, _, gH, _ = x_g.shape
    use_pool = H < gH
    off = int(sum(global_inp[:flag]))
    cg = int(global_inp[flag])
    g_info = x_g[:, off:off + cg]
    local_feat = _conv_ref(x_l, params["wl_oihw"], params["bl"])
    global_act = _conv_ref(g_info, params["wa_oihw"], params["ba"])
    global_feat = _conv_ref(g_info, params["we_oihw"], params["be"])
    if use_pool:
        sig_act = _adaptive_pool_ref(global_act, H, W)     # no h_sigmoid (as in PyTorch)
        global_feat = _adaptive_pool_ref(global_feat, H, W)
    else:
        sig_act = _bilinear_ref(_hsig(global_act), H, W)
        global_feat = _bilinear_ref(global_feat, H, W)
    return local_feat * sig_act + global_feat


# ------------------------------------ main ----------------------------------- #

if __name__ == "__main__":
    key = jax.random.PRNGKey(0)
    kx1, kx2, kx3, kx4, kx5, kx6, kp = jax.random.split(key, 7)

    global_inp = [4, 8]
    flag = 1
    inp, oup = 4, 8
    params = init_params(kp, inp, oup, global_inp[flag])

    # Case 1: global coarser than local -> h_sigmoid + bilinear upsample (1 tile).
    x_l = jax.random.normal(kx1, (2, inp, 16, 16), jnp.float32)
    x_g = jax.random.normal(kx2, (2, sum(global_inp), 8, 8), jnp.float32)
    out = jax.block_until_ready(injection_forward(x_l, x_g, params, global_inp, flag))
    ref = injection_ref(x_l, x_g, params, global_inp, flag)
    assert out.shape == (2, oup, 16, 16), out.shape
    assert jnp.allclose(out, ref, atol=1e-4, rtol=1e-4), float(jnp.max(jnp.abs(out - ref)))

    # Case 2: global finer than local -> adaptive average pool (no h_sigmoid).
    x_l2 = jax.random.normal(kx3, (2, inp, 8, 8), jnp.float32)
    x_g2 = jax.random.normal(kx4, (2, sum(global_inp), 16, 16), jnp.float32)
    out2 = jax.block_until_ready(injection_forward(x_l2, x_g2, params, global_inp, flag))
    ref2 = injection_ref(x_l2, x_g2, params, global_inp, flag)
    assert out2.shape == (2, oup, 8, 8), out2.shape
    assert jnp.allclose(out2, ref2, atol=1e-4, rtol=1e-4), float(jnp.max(jnp.abs(out2 - ref2)))

    # Case 3: bilinear path with multiple pixel tiles (exercises the scratch reuse).
    x_l3 = jax.random.normal(kx5, (2, inp, 32, 32), jnp.float32)
    x_g3 = jax.random.normal(kx6, (2, sum(global_inp), 16, 16), jnp.float32)
    out3 = jax.block_until_ready(
        injection_forward(x_l3, x_g3, params, global_inp, flag, max_tile=512))
    ref3 = injection_ref(x_l3, x_g3, params, global_inp, flag)
    assert out3.shape == (2, oup, 32, 32), out3.shape
    assert jnp.allclose(out3, ref3, atol=1e-4, rtol=1e-4), float(jnp.max(jnp.abs(out3 - ref3)))

    print("KERNEL_OK")
</pallas_src>

<mosaic_0001>
module attributes {stable_mosaic.version = 11 : i64} {
  func.func @_inject_kernel(%arg0: i32, %arg1: i32, %arg2: memref<1x4x256xf32, #tpu.memory_space<vmem>>, %arg3: memref<1x8x64xf32, #tpu.memory_space<vmem>>, %arg4: memref<8x4xf32, #tpu.memory_space<vmem>>, %arg5: memref<8x1xf32, #tpu.memory_space<vmem>>, %arg6: memref<16x8xf32, #tpu.memory_space<vmem>>, %arg7: memref<16x1xf32, #tpu.memory_space<vmem>>, %arg8: memref<16x8xf32, #tpu.memory_space<vmem>>, %arg9: memref<8x16xf32, #tpu.memory_space<vmem>>, %arg10: memref<1x8x256xf32, #tpu.memory_space<vmem>>, %arg11: memref<16x8x8xf32, #tpu.memory_space<vmem>>, %arg12: memref<1x8x256xf32, #tpu.memory_space<vmem>>, %arg13: memref<1x8x256xf32, #tpu.memory_space<vmem>>) attributes {dimension_semantics = [#tpu.dimension_semantics<parallel>, #tpu.dimension_semantics<arbitrary>], iteration_bounds = array<i64: 2, 1>, scalar_prefetch = 0 : i64, scratch_operands = 3 : i64, tpu.core_type = #tpu.core_type<tc>, window_params = [{transform_indices = @transform_0, window_bounds = array<i64: 1, 4, 256>}, {transform_indices = @transform_1, window_bounds = array<i64: 1, 8, 64>}, {pipeline_mode = #tpu.pipeline_mode<synchronous>, transform_indices = @transform_2, window_bounds = array<i64: 8, 4>}, {pipeline_mode = #tpu.pipeline_mode<synchronous>, transform_indices = @transform_3, window_bounds = array<i64: 8, 1>}, {pipeline_mode = #tpu.pipeline_mode<synchronous>, transform_indices = @transform_4, window_bounds = array<i64: 16, 8>}, {pipeline_mode = #tpu.pipeline_mode<synchronous>, transform_indices = @transform_5, window_bounds = array<i64: 16, 1>}, {pipeline_mode = #tpu.pipeline_mode<synchronous>, transform_indices = @transform_6, window_bounds = array<i64: 16, 8>}, {pipeline_mode = #tpu.pipeline_mode<synchronous>, transform_indices = @transform_7, window_bounds = array<i64: 8, 16>}, {transform_indices = @transform_8, window_bounds = array<i64: 1, 8, 256>}]} {
    %c0_i32 = arith.constant 0 : i32
    %0 = arith.cmpi eq, %arg1, %c0_i32 : i32
    %1 = arith.extui %0 : i1 to i32
    %c0_i32_0 = arith.constant 0 : i32
    %2 = arith.cmpi ne, %1, %c0_i32_0 : i32
    scf.if %2 {
      %c0_14 = arith.constant 0 : index
      %c0_15 = arith.constant 0 : index
      %21 = vector.load %arg6[%c0_14, %c0_15] : memref<16x8xf32, #tpu.memory_space<vmem>>, vector<16x8xf32>
      %c0_16 = arith.constant 0 : index
      %c0_17 = arith.constant 0 : index
      %c0_18 = arith.constant 0 : index
      %22 = vector.load %arg3[%c0_16, %c0_17, %c0_18] : memref<1x8x64xf32, #tpu.memory_space<vmem>>, vector<1x8x64xf32>
      %23 = vector.shape_cast %22 : vector<1x8x64xf32> to vector<8x64xf32>
      %cst_19 = arith.constant dense<0.000000e+00> : vector<16x64xf32>
      %24 = tpu.matmul %21, %23, %cst_19 {dimension_numbers = #tpu.dot_dimension_numbers<[1], [0], [0], [1], [0, 0, 1, 1], [], []>} : vector<16x8xf32>, vector<8x64xf32>, vector<16x64xf32> -> vector<16x64xf32>
      %c0_20 = arith.constant 0 : index
      %c0_21 = arith.constant 0 : index
      %25 = vector.load %arg7[%c0_20, %c0_21] : memref<16x1xf32, #tpu.memory_space<vmem>>, vector<16x1xf32>
      %26 = vector.broadcast %25 : vector<16x1xf32> to vector<16x64xf32>
      %27 = arith.addf %24, %26 : vector<16x64xf32>
      %28 = tpu.iota {dimensions = array<i32: 0>} : vector<16x64xi32>
      %cst_22 = arith.constant 3.000000e+00 : f32
      %29 = vector.broadcast %cst_22 : f32 to vector<16x64xf32>
      %30 = arith.addf %27, %29 : vector<16x64xf32>
      %cst_23 = arith.constant 0.000000e+00 : f32
      %cst_24 = arith.constant 6.000000e+00 : f32
      %31 = vector.broadcast %cst_23 : f32 to vector<16x64xf32>
      %32 = arith.maximumf %31, %30 : vector<16x64xf32>
      %33 = vector.broadcast %cst_24 : f32 to vector<16x64xf32>
      %34 = arith.minimumf %33, %32 : vector<16x64xf32>
      %cst_25 = arith.constant 0.166666672 : f32
      %35 = vector.broadcast %cst_25 : f32 to vector<16x64xf32>
      %36 = arith.mulf %34, %35 : vector<16x64xf32>
      %c8_i32 = arith.constant 8 : i32
      %37 = vector.broadcast %c8_i32 : i32 to vector<16x64xi32>
      %38 = arith.cmpi slt, %28, %37 : vector<16x64xi32>
      %39 = arith.select %38, %36, %27 : vector<16x64xi1>, vector<16x64xf32>
      %40 = vector.extract_strided_slice %39 {offsets = [0, 0], sizes = [16, 8], strides = [1, 1]} : vector<16x64xf32> to vector<16x8xf32>
      %c0_26 = arith.constant 0 : index
      %c0_27 = arith.constant 0 : index
      %c0_28 = arith.constant 0 : index
      %41 = vector.load %arg11[%c0_26, %c0_27, %c0_28] : memref<16x8x8xf32, #tpu.memory_space<vmem>>, vector<16x1x8xf32>
      %42 = vector.shape_cast %41 : vector<16x1x8xf32> to vector<16x8xf32>
      %43 = vector.shape_cast %40 : vector<16x8xf32> to vector<16x1x8xf32>
      tpu.vector_store %arg11[%c0_26, %c0_27, %c0_28], %43 {strides = array<i32>} : memref<16x8x8xf32, #tpu.memory_space<vmem>>, vector<16x1x8xf32>,
      %44 = vector.extract_strided_slice %39 {offsets = [0, 8], sizes = [16, 8], strides = [1, 1]} : vector<16x64xf32> to vector<16x8xf32>
      %c0_29 = arith.constant 0 : index
      %c1 = arith.constant 1 : index
      %c0_30 = arith.constant 0 : index
      %45 = vector.load %arg11[%c0_29, %c1, %c0_30] : memref<16x8x8xf32, #tpu.memory_space<vmem>>, vector<16x1x8xf32>
      %46 = vector.shape_cast %45 : vector<16x1x8xf32> to vector<16x8xf32>
      %47 = vector.shape_cast %44 : vector<16x8xf32> to vector<16x1x8xf32>
      tpu.vector_store %arg11[%c0_29, %c1, %c0_30], %47 {strides = array<i32>} : memref<16x8x8xf32, #tpu.memory_space<vmem>>, vector<16x1x8xf32>,
      %48 = vector.extract_strided_slice %39 {offsets = [0, 16], sizes = [16, 8], strides = [1, 1]} : vector<16x64xf32> to vector<16x8xf32>
      %c0_31 = arith.constant 0 : index
      %c2 = arith.constant 2 : index
      %c0_32 = arith.constant 0 : index
      %49 = vector.load %arg11[%c0_31, %c2, %c0_32] : memref<16x8x8xf32, #tpu.memory_space<vmem>>, vector<16x1x8xf32>
      %50 = vector.shape_cast %49 : vector<16x1x8xf32> to vector<16x8xf32>
      %51 = vector.shape_cast %48 : vector<16x8xf32> to vector<16x1x8xf32>
      tpu.vector_store %arg11[%c0_31, %c2, %c0_32], %51 {strides = array<i32>} : memref<16x8x8xf32, #tpu.memory_space<vmem>>, vector<16x1x8xf32>,
      %52 = vector.extract_strided_slice %39 {offsets = [0, 24], sizes = [16, 8], strides = [1, 1]} : vector<16x64xf32> to vector<16x8xf32>
      %c0_33 = arith.constant 0 : index
      %c3 = arith.constant 3 : index
      %c0_34 = arith.constant 0 : index
      %53 = vector.load %arg11[%c0_33, %c3, %c0_34] : memref<16x8x8xf32, #tpu.memory_space<vmem>>, vector<16x1x8xf32>
      %54 = vector.shape_cast %53 : vector<16x1x8xf32> to vector<16x8xf32>
      %55 = vector.shape_cast %52 : vector<16x8xf32> to vector<16x1x8xf32>
      tpu.vector_store %arg11[%c0_33, %c3, %c0_34], %55 {strides = array<i32>} : memref<16x8x8xf32, #tpu.memory_space<vmem>>, vector<16x1x8xf32>,
      %56 = vector.extract_strided_slice %39 {offsets = [0, 32], sizes = [16, 8], strides = [1, 1]} : vector<16x64xf32> to vector<16x8xf32>
      %c0_35 = arith.constant 0 : index
      %c4 = arith.constant 4 : index
      %c0_36 = arith.constant 0 : index
      %57 = vector.load %arg11[%c0_35, %c4, %c0_36] : memref<16x8x8xf32, #tpu.memory_space<vmem>>, vector<16x1x8xf32>
      %58 = vector.shape_cast %57 : vector<16x1x8xf32> to vector<16x8xf32>
      %59 = vector.shape_cast %56 : vector<16x8xf32> to vector<16x1x8xf32>
      tpu.vector_store %arg11[%c0_35, %c4, %c0_36], %59 {strides = array<i32>} : memref<16x8x8xf32, #tpu.memory_space<vmem>>, vector<16x1x8xf32>,
      %60 = vector.extract_strided_slice %39 {offsets = [0, 40], sizes = [16, 8], strides = [1, 1]} : vector<16x64xf32> to vector<16x8xf32>
      %c0_37 = arith.constant 0 : index
      %c5 = arith.constant 5 : index
      %c0_38 = arith.constant 0 : index
      %61 = vector.load %arg11[%c0_37, %c5, %c0_38] : memref<16x8x8xf32, #tpu.memory_space<vmem>>, vector<16x1x8xf32>
      %62 = vector.shape_cast %61 : vector<16x1x8xf32> to vector<16x8xf32>
      %63 = vector.shape_cast %60 : vector<16x8xf32> to vector<16x1x8xf32>
      tpu.vector_store %arg11[%c0_37, %c5, %c0_38], %63 {strides = array<i32>} : memref<16x8x8xf32, #tpu.memory_space<vmem>>, vector<16x1x8xf32>,
      %64 = vector.extract_strided_slice %39 {offsets = [0, 48], sizes = [16, 8], strides = [1, 1]} : vector<16x64xf32> to vector<16x8xf32>
      %c0_39 = arith.constant 0 : index
      %c6 = arith.constant 6 : index
      %c0_40 = arith.constant 0 : index
      %65 = vector.load %arg11[%c0_39, %c6, %c0_40] : memref<16x8x8xf32, #tpu.memory_space<vmem>>, vector<16x1x8xf32>
      %66 = vector.shape_cast %65 : vector<16x1x8xf32> to vector<16x8xf32>
      %67 = vector.shape_cast %64 : vector<16x8xf32> to vector<16x1x8xf32>
      tpu.vector_store %arg11[%c0_39, %c6, %c0_40], %67 {strides = array<i32>} : memref<16x8x8xf32, #tpu.memory_space<vmem>>, vector<16x1x8xf32>,
      %68 = vector.extract_strided_slice %39 {offsets = [0, 56], sizes = [16, 8], strides = [1, 1]} : vector<16x64xf32> to vector<16x8xf32>
      %c0_41 = arith.constant 0 : index
      %c7 = arith.constant 7 : index
      %c0_42 = arith.constant 0 : index
      %69 = vector.load %arg11[%c0_41, %c7, %c0_42] : memref<16x8x8xf32, #tpu.memory_space<vmem>>, vector<16x1x8xf32>
      %70 = vector.shape_cast %69 : vector<16x1x8xf32> to vector<16x8xf32>
      %71 = vector.shape_cast %68 : vector<16x8xf32> to vector<16x1x8xf32>
      tpu.vector_store %arg11[%c0_41, %c7, %c0_42], %71 {strides = array<i32>} : memref<16x8x8xf32, #tpu.memory_space<vmem>>, vector<16x1x8xf32>,
      %c0_43 = arith.constant 0 : index
      %c0_44 = arith.constant 0 : index
      %c0_45 = arith.constant 0 : index
      %72 = vector.load %arg11[%c0_43, %c0_44, %c0_45] : memref<16x8x8xf32, #tpu.memory_space<vmem>>, vector<16x8x8xf32>
      %c0_46 = arith.constant 0 : index
      %c0_47 = arith.constant 0 : index
      %73 = vector.load %arg8[%c0_46, %c0_47] : memref<16x8xf32, #tpu.memory_space<vmem>>, vector<16x8xf32>
      %74 = vector.shape_cast %73 : vector<16x8xf32> to vector<1x16x8xf32>
      %75 = vector.shape_cast %74 : vector<1x16x8xf32> to vector<1x16x8xf32>
      %76 = vector.broadcast %75 : vector<1x16x8xf32> to vector<16x16x8xf32>
      "tpu.trace_start"() <{level = 10 : i32, message = "chg,cgv->chv"}> : () -> ()
      %cst_48 = arith.constant dense<0.000000e+00> : vector<16x16x8xf32>
      %77 = tpu.matmul %76, %72, %cst_48 {dimension_numbers = #tpu.dot_dimension_numbers<[2], [1], [1], [2], [0, 0, 0, 1, 1, 2], [0], [0]>} : vector<16x16x8xf32>, vector<16x8x8xf32>, vector<16x16x8xf32> -> vector<16x16x8xf32>
      "tpu.trace_stop"() : () -> ()
      %c0_49 = arith.constant 0 : index
      %c0_50 = arith.constant 0 : index
      %78 = vector.load %arg9[%c0_49, %c0_50] : memref<8x16xf32, #tpu.memory_space<vmem>>, vector<8x16xf32>
      %79 = vector.shape_cast %78 : vector<8x16xf32> to vector<1x8x16xf32>
      %80 = vector.shape_cast %79 : vector<1x8x16xf32> to vector<1x8x16xf32>
      %81 = vector.broadcast %80 : vector<1x8x16xf32> to vector<16x8x16xf32>
      "tpu.trace_start"() <{level = 10 : i32, message = "chv,cvw->chw"}> : () -> ()
      %cst_51 = arith.constant dense<0.000000e+00> : vector<16x16x16xf32>
      %82 = tpu.matmul %77, %81, %cst_51 {dimension_numbers = #tpu.dot_dimension_numbers<[2], [1], [1], [2], [0, 0, 0, 1, 1, 2], [0], [0]>} : vector<16x16x8xf32>, vector<16x8x16xf32>, vector<16x16x16xf32> -> vector<16x16x16xf32>
      "tpu.trace_stop"() : () -> ()
      %83 = vector.extract_strided_slice %82 {offsets = [0, 0, 0], sizes = [8, 1, 16], strides = [1, 1, 1]} : vector<16x16x16xf32> to vector<8x1x16xf32>
      %84 = vector.shape_cast %83 : vector<8x1x16xf32> to vector<8x16xf32>
      %c0_52 = arith.constant 0 : index
      %c0_53 = arith.constant 0 : index
      %c0_54 = arith.constant 0 : index
      %85 = vector.load %arg12[%c0_52, %c0_53, %c0_54] : memref<1x8x256xf32, #tpu.memory_space<vmem>>, vector<1x8x16xf32>
      %86 = vector.shape_cast %85 : vector<1x8x16xf32> to vector<8x16xf32>
      %87 = vector.shape_cast %84 : vector<8x16xf32> to vector<1x8x16xf32>
      tpu.vector_store %arg12[%c0_52, %c0_53, %c0_54], %87 {strides = array<i32>} : memref<1x8x256xf32, #tpu.memory_space<vmem>>, vector<1x8x16xf32>,
      %88 = vector.extract_strided_slice %82 {offsets = [8, 0, 0], sizes = [8, 1, 16], strides = [1, 1, 1]} : vector<16x16x16xf32> to vector<8x1x16xf32>
      %89 = vector.shape_cast %88 : vector<8x1x16xf32> to vector<8x16xf32>
      %c0_55 = arith.constant 0 : index
      %c0_56 = arith.constant 0 : index
      %c0_57 = arith.constant 0 : index
      %90 = vector.load %arg13[%c0_55, %c0_56, %c0_57] : memref<1x8x256xf32, #tpu.memory_space<vmem>>, vector<1x8x16xf32>
      %91 = vector.shape_cast %90 : vector<1x8x16xf32> to vector<8x16xf32>
      %92 = vector.shape_cast %89 : vector<8x16xf32> to vector<1x8x16xf32>
      tpu.vector_store %arg13[%c0_55, %c0_56, %c0_57], %92 {strides = array<i32>} : memref<1x8x256xf32, #tpu.memory_space<vmem>>, vector<1x8x16xf32>,
      %93 = vector.extract_strided_slice %82 {offsets = [0, 1, 0], sizes = [8, 1, 16], strides = [1, 1, 1]} : vector<16x16x16xf32> to vector<8x1x16xf32>
      %94 = vector.shape_cast %93 : vector<8x1x16xf32> to vector<8x16xf32>
      %c0_58 = arith.constant 0 : index
      %c0_59 = arith.constant 0 : index
      %c16 = arith.constant 16 : index
      %95 = vector.load %arg12[%c0_58, %c0_59, %c16] : memref<1x8x256xf32, #tpu.memory_space<vmem>>, vector<1x8x16xf32>
      %96 = vector.shape_cast %95 : vector<1x8x16xf32> to vector<8x16xf32>
      %97 = vector.shape_cast %94 : vector<8x16xf32> to vector<1x8x16xf32>
      tpu.vector_store %arg12[%c0_58, %c0_59, %c16], %97 {strides = array<i32>} : memref<1x8x256xf32, #tpu.memory_space<vmem>>, vector<1x8x16xf32>,
      %98 = vector.extract_strided_slice %82 {offsets = [8, 1, 0], sizes = [8, 1, 16], strides = [1, 1, 1]} : vector<16x16x16xf32> to vector<8x1x16xf32>
      %99 = vector.shape_cast %98 : vector<8x1x16xf32> to vector<8x16xf32>
      %c0_60 = arith.constant 0 : index
      %c0_61 = arith.constant 0 : index
      %c16_62 = arith.constant 16 : index
      %100 = vector.load %arg13[%c0_60, %c0_61, %c16_62] : memref<1x8x256xf32, #tpu.memory_space<vmem>>, vector<1x8x16xf32>
      %101 = vector.shape_cast %100 : vector<1x8x16xf32> to vector<8x16xf32>
      %102 = vector.shape_cast %99 : vector<8x16xf32> to vector<1x8x16xf32>
      tpu.vector_store %arg13[%c0_60, %c0_61, %c16_62], %102 {strides = array<i32>} : memref<1x8x256xf32, #tpu.memory_space<vmem>>, vector<1x8x16xf32>,
      %103 = vector.extract_strided_slice %82 {offsets = [0, 2, 0], sizes = [8, 1, 16], strides = [1, 1, 1]} : vector<16x16x16xf32> to vector<8x1x16xf32>
      %104 = vector.shape_cast %103 : vector<8x1x16xf32> to vector<8x16xf32>
      %c0_63 = arith.constant 0 : index
      %c0_64 = arith.constant 0 : index
      %c32 = arith.constant 32 : index
      %105 = vector.load %arg12[%c0_63, %c0_64, %c32] : memref<1x8x256xf32, #tpu.memory_space<vmem>>, vector<1x8x16xf32>
      %106 = vector.shape_cast %105 : vector<1x8x16xf32> to vector<8x16xf32>
      %107 = vector.shape_cast %104 : vector<8x16xf32> to vector<1x8x16xf32>
      tpu.vector_store %arg12[%c0_63, %c0_64, %c32], %107 {strides = array<i32>} : memref<1x8x256xf32, #tpu.memory_space<vmem>>, vector<1x8x16xf32>,
      %108 = vector.extract_strided_slice %82 {offsets = [8, 2, 0], sizes = [8, 1, 16], strides = [1, 1, 1]} : vector<16x16x16xf32> to vector<8x1x16xf32>
      %109 = vector.shape_cast %108 : vector<8x1x16xf32> to vector<8x16xf32>
      %c0_65 = arith.constant 0 : index
      %c0_66 = arith.constant 0 : index
      %c32_67 = arith.constant 32 : index
      %110 = vector.load %arg13[%c0_65, %c0_66, %c32_67] : memref<1x8x256xf32, #tpu.memory_space<vmem>>, vector<1x8x16xf32>
      %111 = vector.shape_cast %110 : vector<1x8x16xf32> to vector<8x16xf32>
      %112 = vector.shape_cast %109 : vector<8x16xf32> to vector<1x8x16xf32>
      tpu.vector_store %arg13[%c0_65, %c0_66, %c32_67], %112 {strides = array<i32>} : memref<1x8x256xf32, #tpu.memory_space<vmem>>, vector<1x8x16xf32>,
      %113 = vector.extract_strided_slice %82 {offsets = [0, 3, 0], sizes = [8, 1, 16], strides = [1, 1, 1]} : vector<16x16x16xf32> to vector<8x1x16xf32>
      %114 = vector.shape_cast %113 : vector<8x1x16xf32> to vector<8x16xf32>
      %c0_68 = arith.constant 0 : index
      %c0_69 = arith.constant 0 : index
      %c48 = arith.constant 48 : index
      %115 = vector.load %arg12[%c0_68, %c0_69, %c48] : memref<1x8x256xf32, #tpu.memory_space<vmem>>, vector<1x8x16xf32>
      %116 = vector.shape_cast %115 : vector<1x8x16xf32> to vector<8x16xf32>
      %117 = vector.shape_cast %114 : vector<8x16xf32> to vector<1x8x16xf32>
      tpu.vector_store %arg12[%c0_68, %c0_69, %c48], %117 {strides = array<i32>} : memref<1x8x256xf32, #tpu.memory_space<vmem>>, vector<1x8x16xf32>,
      %118 = vector.extract_strided_slice %82 {offsets = [8, 3, 0], sizes = [8, 1, 16], strides = [1, 1, 1]} : vector<16x16x16xf32> to vector<8x1x16xf32>
      %119 = vector.shape_cast %118 : vector<8x1x16xf32> to vector<8x16xf32>
      %c0_70 = arith.constant 0 : index
      %c0_71 = arith.constant 0 : index
      %c48_72 = arith.constant 48 : index
      %120 = vector.load %arg13[%c0_70, %c0_71, %c48_72] : memref<1x8x256xf32, #tpu.memory_space<vmem>>, vector<1x8x16xf32>
      %121 = vector.shape_cast %120 : vector<1x8x16xf32> to vector<8x16xf32>
      %122 = vector.shape_cast %119 : vector<8x16xf32> to vector<1x8x16xf32>
      tpu.vector_store %arg13[%c0_70, %c0_71, %c48_72], %122 {strides = array<i32>} : memref<1x8x256xf32, #tpu.memory_space<vmem>>, vector<1x8x16xf32>,
      %123 = vector.extract_strided_slice %82 {offsets = [0, 4, 0], sizes = [8, 1, 16], strides = [1, 1, 1]} : vector<16x16x16xf32> to vector<8x1x16xf32>
      %124 = vector.shape_cast %123 : vector<8x1x16xf32> to vector<8x16xf32>
      %c0_73 = arith.constant 0 : index
      %c0_74 = arith.constant 0 : index
      %c64 = arith.constant 64 : index
      %125 = vector.load %arg12[%c0_73, %c0_74, %c64] : memref<1x8x256xf32, #tpu.memory_space<vmem>>, vector<1x8x16xf32>
      %126 = vector.shape_cast %125 : vector<1x8x16xf32> to vector<8x16xf32>
      %127 = vector.shape_cast %124 : vector<8x16xf32> to vector<1x8x16xf32>
      tpu.vector_store %arg12[%c0_73, %c0_74, %c64], %127 {strides = array<i32>} : memref<1x8x256xf32, #tpu.memory_space<vmem>>, vector<1x8x16xf32>,
      %128 = vector.extract_strided_slice %82 {offsets = [8, 4, 0], sizes = [8, 1, 16], strides = [1, 1, 1]} : vector<16x16x16xf32> to vector<8x1x16xf32>
      %129 = vector.shape_cast %128 : vector<8x1x16xf32> to vector<8x16xf32>
      %c0_75 = arith.constant 0 : index
      %c0_76 = arith.constant 0 : index
      %c64_77 = arith.constant 64 : index
      %130 = vector.load %arg13[%c0_75, %c0_76, %c64_77] : memref<1x8x256xf32, #tpu.memory_space<vmem>>, vector<1x8x16xf32>
      %131 = vector.shape_cast %130 : vector<1x8x16xf32> to vector<8x16xf32>
      %132 = vector.shape_cast %129 : vector<8x16xf32> to vector<1x8x16xf32>
      tpu.vector_store %arg13[%c0_75, %c0_76, %c64_77], %132 {strides = array<i32>} : memref<1x8x256xf32, #tpu.memory_space<vmem>>, vector<1x8x16xf32>,
      %133 = vector.extract_strided_slice %82 {offsets = [0, 5, 0], sizes = [8, 1, 16], strides = [1, 1, 1]} : vector<16x16x16xf32> to vector<8x1x16xf32>
      %134 = vector.shape_cast %133 : vector<8x1x16xf32> to vector<8x16xf32>
      %c0_78 = arith.constant 0 : index
      %c0_79 = arith.constant 0 : index
      %c80 = arith.constant 80 : index
      %135 = vector.load %arg12[%c0_78, %c0_79, %c80] : memref<1x8x256xf32, #tpu.memory_space<vmem>>, vector<1x8x16xf32>
      %136 = vector.shape_cast %135 : vector<1x8x16xf32> to vector<8x16xf32>
      %137 = vector.shape_cast %134 : vector<8x16xf32> to vector<1x8x16xf32>
      tpu.vector_store %arg12[%c0_78, %c0_79, %c80], %137 {strides = array<i32>} : memref<1x8x256xf32, #tpu.memory_space<vmem>>, vector<1x8x16xf32>,
      %138 = vector.extract_strided_slice %82 {offsets = [8, 5, 0], sizes = [8, 1, 16], strides = [1, 1, 1]} : vector<16x16x16xf32> to vector<8x1x16xf32>
      %139 = vector.shape_cast %138 : vector<8x1x16xf32> to vector<8x16xf32>
      %c0_80 = arith.constant 0 : index
      %c0_81 = arith.constant 0 : index
      %c80_82 = arith.constant 80 : index
      %140 = vector.load %arg13[%c0_80, %c0_81, %c80_82] : memref<1x8x256xf32, #tpu.memory_space<vmem>>, vector<1x8x16xf32>
      %141 = vector.shape_cast %140 : vector<1x8x16xf32> to vector<8x16xf32>
      %142 = vector.shape_cast %139 : vector<8x16xf32> to vector<1x8x16xf32>
      tpu.vector_store %arg13[%c0_80, %c0_81, %c80_82], %142 {strides = array<i32>} : memref<1x8x256xf32, #tpu.memory_space<vmem>>, vector<1x8x16xf32>,
      %143 = vector.extract_strided_slice %82 {offsets = [0, 6, 0], sizes = [8, 1, 16], strides = [1, 1, 1]} : vector<16x16x16xf32> to vector<8x1x16xf32>
      %144 = vector.shape_cast %143 : vector<8x1x16xf32> to vector<8x16xf32>
      %c0_83 = arith.constant 0 : index
      %c0_84 = arith.constant 0 : index
      %c96 = arith.constant 96 : index
      %145 = vector.load %arg12[%c0_83, %c0_84, %c96] : memref<1x8x256xf32, #tpu.memory_space<vmem>>, vector<1x8x16xf32>
      %146 = vector.shape_cast %145 : vector<1x8x16xf32> to vector<8x16xf32>
      %147 = vector.shape_cast %144 : vector<8x16xf32> to vector<1x8x16xf32>
      tpu.vector_store %arg12[%c0_83, %c0_84, %c96], %147 {strides = array<i32>} : memref<1x8x256xf32, #tpu.memory_space<vmem>>, vector<1x8x16xf32>,
      %148 = vector.extract_strided_slice %82 {offsets = [8, 6, 0], sizes = [8, 1, 16], strides = [1, 1, 1]} : vector<16x16x16xf32> to vector<8x1x16xf32>
      %149 = vector.shape_cast %148 : vector<8x1x16xf32> to vector<8x16xf32>
      %c0_85 = arith.constant 0 : index
      %c0_86 = arith.constant 0 : index
      %c96_87 = arith.constant 96 : index
      %150 = vector.load %arg13[%c0_85, %c0_86, %c96_87] : memref<1x8x256xf32, #tpu.memory_space<vmem>>, vector<1x8x16xf32>
      %151 = vector.shape_cast %150 : vector<1x8x16xf32> to vector<8x16xf32>
      %152 = vector.shape_cast %149 : vector<8x16xf32> to vector<1x8x16xf32>
      tpu.vector_store %arg13[%c0_85, %c0_86, %c96_87], %152 {strides = array<i32>} : memref<1x8x256xf32, #tpu.memory_space<vmem>>, vector<1x8x16xf32>,
      %153 = vector.extract_strided_slice %82 {offsets = [0, 7, 0], sizes = [8, 1, 16], strides = [1, 1, 1]} : vector<16x16x16xf32> to vector<8x1x16xf32>
      %154 = vector.shape_cast %153 : vector<8x1x16xf32> to vector<8x16xf32>
      %c0_88 = arith.constant 0 : index
      %c0_89 = arith.constant 0 : index
      %c112 = arith.constant 112 : index
      %155 = vector.load %arg12[%c0_88, %c0_89, %c112] : memref<1x8x256xf32, #tpu.memory_space<vmem>>, vector<1x8x16xf32>
      %156 = vector.shape_cast %155 : vector<1x8x16xf32> to vector<8x16xf32>
      %157 = vector.shape_cast %154 : vector<8x16xf32> to vector<1x8x16xf32>
      tpu.vector_store %arg12[%c0_88, %c0_89, %c112], %157 {strides = array<i32>} : memref<1x8x256xf32, #tpu.memory_space<vmem>>, vector<1x8x16xf32>,
      %158 = vector.extract_strided_slice %82 {offsets = [8, 7, 0], sizes = [8, 1, 16], strides = [1, 1, 1]} : vector<16x16x16xf32> to vector<8x1x16xf32>
      %159 = vector.shape_cast %158 : vector<8x1x16xf32> to vector<8x16xf32>
      %c0_90 = arith.constant 0 : index
      %c0_91 = arith.constant 0 : index
      %c112_92 = arith.constant 112 : index
      %160 = vector.load %arg13[%c0_90, %c0_91, %c112_92] : memref<1x8x256xf32, #tpu.memory_space<vmem>>, vector<1x8x16xf32>
      %161 = vector.shape_cast %160 : vector<1x8x16xf32> to vector<8x16xf32>
      %162 = vector.shape_cast %159 : vector<8x16xf32> to vector<1x8x16xf32>
      tpu.vector_store %arg13[%c0_90, %c0_91, %c112_92], %162 {strides = array<i32>} : memref<1x8x256xf32, #tpu.memory_space<vmem>>, vector<1x8x16xf32>,
      %163 = vector.extract_strided_slice %82 {offsets = [0, 8, 0], sizes = [8, 1, 16], strides = [1, 1, 1]} : vector<16x16x16xf32> to vector<8x1x16xf32>
      %164 = vector.shape_cast %163 : vector<8x1x16xf32> to vector<8x16xf32>
      %c0_93 = arith.constant 0 : index
      %c0_94 = arith.constant 0 : index
      %c128 = arith.constant 128 : index
      %165 = vector.load %arg12[%c0_93, %c0_94, %c128] : memref<1x8x256xf32, #tpu.memory_space<vmem>>, vector<1x8x16xf32>
      %166 = vector.shape_cast %165 : vector<1x8x16xf32> to vector<8x16xf32>
      %167 = vector.shape_cast %164 : vector<8x16xf32> to vector<1x8x16xf32>
      tpu.vector_store %arg12[%c0_93, %c0_94, %c128], %167 {strides = array<i32>} : memref<1x8x256xf32, #tpu.memory_space<vmem>>, vector<1x8x16xf32>,
      %168 = vector.extract_strided_slice %82 {offsets = [8, 8, 0], sizes = [8, 1, 16], strides = [1, 1, 1]} : vector<16x16x16xf32> to vector<8x1x16xf32>
      %169 = vector.shape_cast %168 : vector<8x1x16xf32> to vector<8x16xf32>
      %c0_95 = arith.constant 0 : index
      %c0_96 = arith.constant 0 : index
      %c128_97 = arith.constant 128 : index
      %170 = vector.load %arg13[%c0_95, %c0_96, %c128_97] : memref<1x8x256xf32, #tpu.memory_space<vmem>>, vector<1x8x16xf32>
      %171 = vector.shape_cast %170 : vector<1x8x16xf32> to vector<8x16xf32>
      %172 = vector.shape_cast %169 : vector<8x16xf32> to vector<1x8x16xf32>
      tpu.vector_store %arg13[%c0_95, %c0_96, %c128_97], %172 {strides = array<i32>} : memref<1x8x256xf32, #tpu.memory_space<vmem>>, vector<1x8x16xf32>,
      %173 = vector.extract_strided_slice %82 {offsets = [0, 9, 0], sizes = [8, 1, 16], strides = [1, 1, 1]} : vector<16x16x16xf32> to vector<8x1x16xf32>
      %174 = vector.shape_cast %173 : vector<8x1x16xf32> to vector<8x16xf32>
      %c0_98 = arith.constant 0 : index
      %c0_99 = arith.constant 0 : index
      %c144 = arith.constant 144 : index
      %175 = vector.load %arg12[%c0_98, %c0_99, %c144] : memref<1x8x256xf32, #tpu.memory_space<vmem>>, vector<1x8x16xf32>
      %176 = vector.shape_cast %175 : vector<1x8x16xf32> to vector<8x16xf32>
      %177 = vector.shape_cast %174 : vector<8x16xf32> to vector<1x8x16xf32>
      tpu.vector_store %arg12[%c0_98, %c0_99, %c144], %177 {strides = array<i32>} : memref<1x8x256xf32, #tpu.memory_space<vmem>>, vector<1x8x16xf32>,
      %178 = vector.extract_strided_slice %82 {offsets = [8, 9, 0], sizes = [8, 1, 16], strides = [1, 1, 1]} : vector<16x16x16xf32> to vector<8x1x16xf32>
      %179 = vector.shape_cast %178 : vector<8x1x16xf32> to vector<8x16xf32>
      %c0_100 = arith.constant 0 : index
      %c0_101 = arith.constant 0 : index
      %c144_102 = arith.constant 144 : index
      %180 = vector.load %arg13[%c0_100, %c0_101, %c144_102] : memref<1x8x256xf32, #tpu.memory_space<vmem>>, vector<1x8x16xf32>
      %181 = vector.shape_cast %180 : vector<1x8x16xf32> to vector<8x16xf32>
      %182 = vector.shape_cast %179 : vector<8x16xf32> to vector<1x8x16xf32>
      tpu.vector_store %arg13[%c0_100, %c0_101, %c144_102], %182 {strides = array<i32>} : memref<1x8x256xf32, #tpu.memory_space<vmem>>, vector<1x8x16xf32>,
      %183 = vector.extract_strided_slice %82 {offsets = [0, 10, 0], sizes = [8, 1, 16], strides = [1, 1, 1]} : vector<16x16x16xf32> to vector<8x1x16xf32>
      %184 = vector.shape_cast %183 : vector<8x1x16xf32> to vector<8x16xf32>
      %c0_103 = arith.constant 0 : index
      %c0_104 = arith.constant 0 : index
      %c160 = arith.constant 160 : index
      %185 = vector.load %arg12[%c0_103, %c0_104, %c160] : memref<1x8x256xf32, #tpu.memory_space<vmem>>, vector<1x8x16xf32>
      %186 = vector.shape_cast %185 : vector<1x8x16xf32> to vector<8x16xf32>
      %187 = vector.shape_cast %184 : vector<8x16xf32> to vector<1x8x16xf32>
      tpu.vector_store %arg12[%c0_103, %c0_104, %c160], %187 {strides = array<i32>} : memref<1x8x256xf32, #tpu.memory_space<vmem>>, vector<1x8x16xf32>,
      %188 = vector.extract_strided_slice %82 {offsets = [8, 10, 0], sizes = [8, 1, 16], strides = [1, 1, 1]} : vector<16x16x16xf32> to vector<8x1x16xf32>
      %189 = vector.shape_cast %188 : vector<8x1x16xf32> to vector<8x16xf32>
      %c0_105 = arith.constant 0 : index
      %c0_106 = arith.constant 0 : index
      %c160_107 = arith.constant 160 : index
      %190 = vector.load %arg13[%c0_105, %c0_106, %c160_107] : memref<1x8x256xf32, #tpu.memory_space<vmem>>, vector<1x8x16xf32>
      %191 = vector.shape_cast %190 : vector<1x8x16xf32> to vector<8x16xf32>
      %192 = vector.shape_cast %189 : vector<8x16xf32> to vector<1x8x16xf32>
      tpu.vector_store %arg13[%c0_105, %c0_106, %c160_107], %192 {strides = array<i32>} : memref<1x8x256xf32, #tpu.memory_space<vmem>>, vector<1x8x16xf32>,
      %193 = vector.extract_strided_slice %82 {offsets = [0, 11, 0], sizes = [8, 1, 16], strides = [1, 1, 1]} : vector<16x16x16xf32> to vector<8x1x16xf32>
      %194 = vector.shape_cast %193 : vector<8x1x16xf32> to vector<8x16xf32>
      %c0_108 = arith.constant 0 : index
      %c0_109 = arith.constant 0 : index
      %c176 = arith.constant 176 : index
      %195 = vector.load %arg12[%c0_108, %c0_109, %c176] : memref<1x8x256xf32, #tpu.memory_space<vmem>>, vector<1x8x16xf32>
      %196 = vector.shape_cast %195 : vector<1x8x16xf32> to vector<8x16xf32>
      %197 = vector.shape_cast %194 : vector<8x16xf32> to vector<1x8x16xf32>
      tpu.vector_store %arg12[%c0_108, %c0_109, %c176], %197 {strides = array<i32>} : memref<1x8x256xf32, #tpu.memory_space<vmem>>, vector<1x8x16xf32>,
      %198 = vector.extract_strided_slice %82 {offsets = [8, 11, 0], sizes = [8, 1, 16], strides = [1, 1, 1]} : vector<16x16x16xf32> to vector<8x1x16xf32>
      %199 = vector.shape_cast %198 : vector<8x1x16xf32> to vector<8x16xf32>
      %c0_110 = arith.constant 0 : index
      %c0_111 = arith.constant 0 : index
      %c176_112 = arith.constant 176 : index
      %200 = vector.load %arg13[%c0_110, %c0_111, %c176_112] : memref<1x8x256xf32, #tpu.memory_space<vmem>>, vector<1x8x16xf32>
      %201 = vector.shape_cast %200 : vector<1x8x16xf32> to vector<8x16xf32>
      %202 = vector.shape_cast %199 : vector<8x16xf32> to vector<1x8x16xf32>
      tpu.vector_store %arg13[%c0_110, %c0_111, %c176_112], %202 {strides = array<i32>} : memref<1x8x256xf32, #tpu.memory_space<vmem>>, vector<1x8x16xf32>,
      %203 = vector.extract_strided_slice %82 {offsets = [0, 12, 0], sizes = [8, 1, 16], strides = [1, 1, 1]} : vector<16x16x16xf32> to vector<8x1x16xf32>
      %204 = vector.shape_cast %203 : vector<8x1x16xf32> to vector<8x16xf32>
      %c0_113 = arith.constant 0 : index
      %c0_114 = arith.constant 0 : index
      %c192 = arith.constant 192 : index
      %205 = vector.load %arg12[%c0_113, %c0_114, %c192] : memref<1x8x256xf32, #tpu.memory_space<vmem>>, vector<1x8x16xf32>
      %206 = vector.shape_cast %205 : vector<1x8x16xf32> to vector<8x16xf32>
      %207 = vector.shape_cast %204 : vector<8x16xf32> to vector<1x8x16xf32>
      tpu.vector_store %arg12[%c0_113, %c0_114, %c192], %207 {strides = array<i32>} : memref<1x8x256xf32, #tpu.memory_space<vmem>>, vector<1x8x16xf32>,
      %208 = vector.extract_strided_slice %82 {offsets = [8, 12, 0], sizes = [8, 1, 16], strides = [1, 1, 1]} : vector<16x16x16xf32> to vector<8x1x16xf32>
      %209 = vector.shape_cast %208 : vector<8x1x16xf32> to vector<8x16xf32>
      %c0_115 = arith.constant 0 : index
      %c0_116 = arith.constant 0 : index
      %c192_117 = arith.constant 192 : index
      %210 = vector.load %arg13[%c0_115, %c0_116, %c192_117] : memref<1x8x256xf32, #tpu.memory_space<vmem>>, vector<1x8x16xf32>
      %211 = vector.shape_cast %210 : vector<1x8x16xf32> to vector<8x16xf32>
      %212 = vector.shape_cast %209 : vector<8x16xf32> to vector<1x8x16xf32>
      tpu.vector_store %arg13[%c0_115, %c0_116, %c192_117], %212 {strides = array<i32>} : memref<1x8x256xf32, #tpu.memory_space<vmem>>, vector<1x8x16xf32>,
      %213 = vector.extract_strided_slice %82 {offsets = [0, 13, 0], sizes = [8, 1, 16], strides = [1, 1, 1]} : vector<16x16x16xf32> to vector<8x1x16xf32>
      %214 = vector.shape_cast %213 : vector<8x1x16xf32> to vector<8x16xf32>
      %c0_118 = arith.constant 0 : index
      %c0_119 = arith.constant 0 : index
      %c208 = arith.constant 208 : index
      %215 = vector.load %arg12[%c0_118, %c0_119, %c208] : memref<1x8x256xf32, #tpu.memory_space<vmem>>, vector<1x8x16xf32>
      %216 = vector.shape_cast %215 : vector<1x8x16xf32> to vector<8x16xf32>
      %217 = vector.shape_cast %214 : vector<8x16xf32> to vector<1x8x16xf32>
      tpu.vector_store %arg12[%c0_118, %c0_119, %c208], %217 {strides = array<i32>} : memref<1x8x256xf32, #tpu.memory_space<vmem>>, vector<1x8x16xf32>,
      %218 = vector.extract_strided_slice %82 {offsets = [8, 13, 0], sizes = [8, 1, 16], strides = [1, 1, 1]} : vector<16x16x16xf32> to vector<8x1x16xf32>
      %219 = vector.shape_cast %218 : vector<8x1x16xf32> to vector<8x16xf32>
      %c0_120 = arith.constant 0 : index
      %c0_121 = arith.constant 0 : index
      %c208_122 = arith.constant 208 : index
      %220 = vector.load %arg13[%c0_120, %c0_121, %c208_122] : memref<1x8x256xf32, #tpu.memory_space<vmem>>, vector<1x8x16xf32>
      %221 = vector.shape_cast %220 : vector<1x8x16xf32> to vector<8x16xf32>
      %222 = vector.shape_cast %219 : vector<8x16xf32> to vector<1x8x16xf32>
      tpu.vector_store %arg13[%c0_120, %c0_121, %c208_122], %222 {strides = array<i32>} : memref<1x8x256xf32, #tpu.memory_space<vmem>>, vector<1x8x16xf32>,
      %223 = vector.extract_strided_slice %82 {offsets = [0, 14, 0], sizes = [8, 1, 16], strides = [1, 1, 1]} : vector<16x16x16xf32> to vector<8x1x16xf32>
      %224 = vector.shape_cast %223 : vector<8x1x16xf32> to vector<8x16xf32>
      %c0_123 = arith.constant 0 : index
      %c0_124 = arith.constant 0 : index
      %c224 = arith.constant 224 : index
      %225 = vector.load %arg12[%c0_123, %c0_124, %c224] : memref<1x8x256xf32, #tpu.memory_space<vmem>>, vector<1x8x16xf32>
      %226 = vector.shape_cast %225 : vector<1x8x16xf32> to vector<8x16xf32>
      %227 = vector.shape_cast %224 : vector<8x16xf32> to vector<1x8x16xf32>
      tpu.vector_store %arg12[%c0_123, %c0_124, %c224], %227 {strides = array<i32>} : memref<1x8x256xf32, #tpu.memory_space<vmem>>, vector<1x8x16xf32>,
      %228 = vector.extract_strided_slice %82 {offsets = [8, 14, 0], sizes = [8, 1, 16], strides = [1, 1, 1]} : vector<16x16x16xf32> to vector<8x1x16xf32>
      %229 = vector.shape_cast %228 : vector<8x1x16xf32> to vector<8x16xf32>
      %c0_125 = arith.constant 0 : index
      %c0_126 = arith.constant 0 : index
      %c224_127 = arith.constant 224 : index
      %230 = vector.load %arg13[%c0_125, %c0_126, %c224_127] : memref<1x8x256xf32, #tpu.memory_space<vmem>>, vector<1x8x16xf32>
      %231 = vector.shape_cast %230 : vector<1x8x16xf32> to vector<8x16xf32>
      %232 = vector.shape_cast %229 : vector<8x16xf32> to vector<1x8x16xf32>
      tpu.vector_store %arg13[%c0_125, %c0_126, %c224_127], %232 {strides = array<i32>} : memref<1x8x256xf32, #tpu.memory_space<vmem>>, vector<1x8x16xf32>,
      %233 = vector.extract_strided_slice %82 {offsets = [0, 15, 0], sizes = [8, 1, 16], strides = [1, 1, 1]} : vector<16x16x16xf32> to vector<8x1x16xf32>
      %234 = vector.shape_cast %233 : vector<8x1x16xf32> to vector<8x16xf32>
      %c0_128 = arith.constant 0 : index
      %c0_129 = arith.constant 0 : index
      %c240 = arith.constant 240 : index
      %235 = vector.load %arg12[%c0_128, %c0_129, %c240] : memref<1x8x256xf32, #tpu.memory_space<vmem>>, vector<1x8x16xf32>
      %236 = vector.shape_cast %235 : vector<1x8x16xf32> to vector<8x16xf32>
      %237 = vector.shape_cast %234 : vector<8x16xf32> to vector<1x8x16xf32>
      tpu.vector_store %arg12[%c0_128, %c0_129, %c240], %237 {strides = array<i32>} : memref<1x8x256xf32, #tpu.memory_space<vmem>>, vector<1x8x16xf32>,
      %238 = vector.extract_strided_slice %82 {offsets = [8, 15, 0], sizes = [8, 1, 16], strides = [1, 1, 1]} : vector<16x16x16xf32> to vector<8x1x16xf32>
      %239 = vector.shape_cast %238 : vector<8x1x16xf32> to vector<8x16xf32>
      %c0_130 = arith.constant 0 : index
      %c0_131 = arith.constant 0 : index
      %c240_132 = arith.constant 240 : index
      %240 = vector.load %arg13[%c0_130, %c0_131, %c240_132] : memref<1x8x256xf32, #tpu.memory_space<vmem>>, vector<1x8x16xf32>
      %241 = vector.shape_cast %240 : vector<1x8x16xf32> to vector<8x16xf32>
      %242 = vector.shape_cast %239 : vector<8x16xf32> to vector<1x8x16xf32>
      tpu.vector_store %arg13[%c0_130, %c0_131, %c240_132], %242 {strides = array<i32>} : memref<1x8x256xf32, #tpu.memory_space<vmem>>, vector<1x8x16xf32>,
    } else {
    }
    %c0 = arith.constant 0 : index
    %c0_1 = arith.constant 0 : index
    %3 = vector.load %arg4[%c0, %c0_1] : memref<8x4xf32, #tpu.memory_space<vmem>>, vector<8x4xf32>
    %c0_2 = arith.constant 0 : index
    %c0_3 = arith.constant 0 : index
    %c0_4 = arith.constant 0 : index
    %4 = vector.load %arg2[%c0_2, %c0_3, %c0_4] : memref<1x4x256xf32, #tpu.memory_space<vmem>>, vector<1x4x256xf32>
    %5 = vector.shape_cast %4 : vector<1x4x256xf32> to vector<4x256xf32>
    %cst = arith.constant dense<0.000000e+00> : vector<8x256xf32>
    %6 = tpu.matmul %3, %5, %cst {dimension_numbers = #tpu.dot_dimension_numbers<[1], [0], [0], [1], [0, 0, 1, 1], [], []>} : vector<8x4xf32>, vector<4x256xf32>, vector<8x256xf32> -> vector<8x256xf32>
    %c0_5 = arith.constant 0 : index
    %c0_6 = arith.constant 0 : index
    %7 = vector.load %arg5[%c0_5, %c0_6] : memref<8x1xf32, #tpu.memory_space<vmem>>, vector<8x1xf32>
    %8 = vector.broadcast %7 : vector<8x1xf32> to vector<8x256xf32>
    %9 = arith.addf %6, %8 : vector<8x256xf32>
    %10 = arith.index_cast %arg1 : i32 to index
    %c0_7 = arith.constant 0 : index
    %c0_8 = arith.constant 0 : index
    %11 = vector.load %arg12[%10, %c0_7, %c0_8] : memref<1x8x256xf32, #tpu.memory_space<vmem>>, vector<1x8x256xf32>
    %12 = vector.shape_cast %11 : vector<1x8x256xf32> to vector<8x256xf32>
    %13 = arith.mulf %9, %12 : vector<8x256xf32>
    %14 = arith.index_cast %arg1 : i32 to index
    %c0_9 = arith.constant 0 : index
    %c0_10 = arith.constant 0 : index
    %15 = vector.load %arg13[%14, %c0_9, %c0_10] : memref<1x8x256xf32, #tpu.memory_space<vmem>>, vector<1x8x256xf32>
    %16 = vector.shape_cast %15 : vector<1x8x256xf32> to vector<8x256xf32>
    %17 = arith.addf %13, %16 : vector<8x256xf32>
    %c0_11 = arith.constant 0 : index
    %c0_12 = arith.constant 0 : index
    %c0_13 = arith.constant 0 : index
    %18 = vector.load %arg10[%c0_11, %c0_12, %c0_13] : memref<1x8x256xf32, #tpu.memory_space<vmem>>, vector<1x8x256xf32>
    %19 = vector.shape_cast %18 : vector<1x8x256xf32> to vector<8x256xf32>
    %20 = vector.shape_cast %17 : vector<8x256xf32> to vector<1x8x256xf32>
    tpu.vector_store %arg10[%c0_11, %c0_12, %c0_13], %20 {strides = array<i32>} : memref<1x8x256xf32, #tpu.memory_space<vmem>>, vector<1x8x256xf32>,
    return
  }
  func.func @transform_0(%arg0: i32, %arg1: i32) -> (i32, i32, i32) {
    %c0_i32 = arith.constant 0 : i32
    %c0_i32_0 = arith.constant 0 : i32
    return %arg0, %c0_i32, %arg1 : i32, i32, i32
  }
  func.func @transform_1(%arg0: i32, %arg1: i32) -> (i32, i32, i32) {
    %c0_i32 = arith.constant 0 : i32
    %c0_i32_0 = arith.constant 0 : i32
    %c0_i32_1 = arith.constant 0 : i32
    return %arg0, %c0_i32, %c0_i32_0 : i32, i32, i32
  }
  func.func @transform_2(%arg0: i32, %arg1: i32) -> (i32, i32) {
    %c0_i32 = arith.constant 0 : i32
    %c0_i32_0 = arith.constant 0 : i32
    %c0_i32_1 = arith.constant 0 : i32
    return %c0_i32, %c0_i32_0 : i32, i32
  }
  func.func @transform_3(%arg0: i32, %arg1: i32) -> (i32, i32) {
    %c0_i32 = arith.constant 0 : i32
    %c0_i32_0 = arith.constant 0 : i32
    %c0_i32_1 = arith.constant 0 : i32
    return %c0_i32, %c0_i32_0 : i32, i32
  }
  func.func @transform_4(%arg0: i32, %arg1: i32) -> (i32, i32) {
    %c0_i32 = arith.constant 0 : i32
    %c0_i32_0 = arith.constant 0 : i32
    %c0_i32_1 = arith.constant 0 : i32
    return %c0_i32, %c0_i32_0 : i32, i32
  }
  func.func @transform_5(%arg0: i32, %arg1: i32) -> (i32, i32) {
    %c0_i32 = arith.constant 0 : i32
    %c0_i32_0 = arith.constant 0 : i32
    %c0_i32_1 = arith.constant 0 : i32
    return %c0_i32, %c0_i32_0 : i32, i32
  }
  func.func @transform_6(%arg0: i32, %arg1: i32) -> (i32, i32) {
    %c0_i32 = arith.constant 0 : i32
    %c0_i32_0 = arith.constant 0 : i32
    %c0_i32_1 = arith.constant 0 : i32
    return %c0_i32, %c0_i32_0 : i32, i32
  }
  func.func @transform_7(%arg0: i32, %arg1: i32) -> (i32, i32) {
    %c0_i32 = arith.constant 0 : i32
    %c0_i32_0 = arith.constant 0 : i32
    %c0_i32_1 = arith.constant 0 : i32
    return %c0_i32, %c0_i32_0 : i32, i32
  }
  func.func @transform_8(%arg0: i32, %arg1: i32) -> (i32, i32, i32) {
    %c0_i32 = arith.constant 0 : i32
    %c0_i32_0 = arith.constant 0 : i32
    return %arg0, %c0_i32, %arg1 : i32, i32, i32
  }
}

</mosaic_0001>

<bundles_post_ra>
// kernel: tpu_custom_call.1
= control target key start
LH: loop header
LB: loop body
LE: loop exit
PB: predicated region body
PF: predicated region fallthrough
CT: control target
= control target key end

     0   :  { %13 = vsyncpa [#allocation6], 0  ;;  %s6343_s0 = inlined_call_operand.vmem [shape: f32[2,4,256], index: 0, kind: input, shape index: {}]   ;;  %s6344_s1 = inlined_call_operand.vmem [shape: f32[2,8,64], index: 1, kind: input, shape index: {}]   ;;  %s6345_s2 = inlined_call_operand.vmem [shape: f32[8,4], index: 2, kind: input, shape index: {}]   ;;  %s6346_s3 = inlined_call_operand.vmem [shape: f32[8,1], index: 3, kind: input, shape index: {}]   ;;  %s6347_s4 = inlined_call_operand.vmem [shape: f32[16,8], index: 4, kind: input, shape index: {}]   ;;  %s6348_s5 = inlined_call_operand.vmem [shape: f32[16,1], index: 5, kind: input, shape index: {}]   ;;  %s6349_s6 = inlined_call_operand.vmem [shape: f32[16,8], index: 6, kind: input, shape index: {}]   ;;  %s6350_s7 = inlined_call_operand.vmem [shape: f32[8,16], index: 7, kind: input, shape index: {}]   ;;  %s6351_s8 = inlined_call_operand.hbm [shape: f32[2,8,256], index: 8, kind: output, shape index: {}]  }
   0x1   :  { %15 = vsyncpa [#allocation6 + $0x1], 0  ;;  %s5023_s27 = smov 0   ;;  %s5025_s28 = smov 0  }
   0x2   :  { %s5027_s29 = smov 0   ;;  %s5029_s30 = smov 0  }
   0x3   :  { %s5031_s9 = smov 0   ;;  %s5033_s10 = smov 0  }
   0x4 LB: > { %s4463_s11 = sadd.s32 4294967295, %s4961_s10   ;;  %s4464_s12 = sadd.s32 4294967294, %s4961_s10   ;;  %s4961_s10 = sphi %s5033_s10, %s21_s10   ;;  %s4957_s9 = sphi %s5031_s9, %s6382_s9   ;;  %s4953_s30 = sphi %s5029_s30, %s6381_s30   ;;  %s4949_s29 = sphi %s5027_s29, %s6380_s29   ;;  %s4945_s28 = sphi %s5025_s28, %s6379_s28   ;;  %s4941_s27 = sphi %s5023_s27, %s6378_s27  }
   0x5   : > { %s33_s13 = sadd.s32 1, %s4957_s9  ;;  %s222_s14 = sadd.s32 1, %s4949_s29 }
   0x6   : > { %p35_p0 = scmp.ge.s32.totalorder %s33_s13, 2  ;;  %p232_p1 = scmp.ne.s32.totalorder %s4949_s29, %s4945_s28 }
   0x7   : > { %p233_p2 = scmp.eq.s32.totalorder %s4463_s11, 1  ;;  %p238_p3 = scmp.ne.s32.totalorder %s4945_s28, %s4941_s27 }
   0x8   : > { %s6384_s13 = smov (%p35_p0, %s33_s13), 0  ;;  %p239_p5 = scmp.eq.s32.totalorder %s4464_s12, 1 }
   0x9   : > { %p5063_p4 = por %p233_p2, %p232_p1  ;;  %s217_s16 = ssub.s32 %s4957_s9, %s6384_s13 }
   0xa   : > { %p4467_p6 = scmp.ge.s32.totalorder %s4961_s10, 1  ;;  %p220_p7 = scmp.eq.s32.totalorder %s217_s16, 0 }
   0xb   : > { %p5070_p8 = por %p239_p5, %p238_p3  ;;  %p295_p9 = scmp.lt.s32.totalorder %s4961_s10, 3 }
   0xc   : > { %s5076_s18 = scalar_select %p220_p7, %s4949_s29, %s222_s14  }
   0xd   : > { %p296_p10 = pnand %p4467_p6, %p295_p9 }
   0xe   : > { %p338_p11 = scmp.lt.s32.totalorder (!%p296_p10), %s4953_s30, 1  ;;  %v356_v0 = vld [vmem:[%s6347_s4] sm:$0xff] (!%p296_p10)  ;;  %vm371_vm0 = vcmask (!%p296_p10), 64512   ;;  %v4963_v2 = vmov (!%p296_p10), 0   ;;  %v360_v3 = vld [vmem:[%s6348_s5 + $0x8] sm:$0xff] (!%p296_p10)  ;;  %v474_v8 = vlaneseq (!%p296_p10)  ;;  %vm584_vm1 = vcmask (!%p296_p10), 57344  }
   0xf   : > { %299 = sbr.rel (%p296_p10) target bundleno = 1203 (0x4b3), region = 52  ;;  %v359_v1 = vld [vmem:[%s6348_s5] sm:$0xff] (!%p296_p10)  ;;  %4649 = vmatprep.mubr.msk.f32.mxu0 (!%p296_p10), %vm371_vm0, %v356_v0  ;;  %4881 = vset.pattern.permute.xlu0 (!%p296_p10), %v4963_v2  ;;  %v357_v5 = vld [vmem:[%s6347_s4 + $0x8] sm:$0xff] (!%p296_p10)  ;;  %v4964_v6 = vmov (!%p296_p10), 1966171168   ;;  %s4965_s20 = smov (!%p296_p10), 112  }
  0x10   : > { %363 = vperm.xlu0 (!%p296_p10), %4881, %v359_v1   ;;  %v472_v7 = vunpack.c.l.s4 (!%p296_p10), %v4964_v6  ;;  %v475_v11 = vshrl.u32 (!%p296_p10), %v474_v8, 7  ;;  %s4966_s21 = smov (!%p296_p10), 120   ;;  %s4967_s22 = smov (!%p296_p10), 96   ;;  %vm4263_vm2 = vcmask (!%p296_p10), 1043456   ;;  %vm4259_vm3 = vcmask (!%p296_p10), 31744  }
  0x11   : > { %s4968_s24 = smov (!%p296_p10), 104   ;;  %s4969_s25 = smov (!%p296_p10), 80   ;;  %vm3643_vm4 = vcmask (!%p296_p10), 1041409   ;;  %vm3646_vm5 = vcmask (!%p296_p10), 1042434   ;;  %vm3649_vm6 = vcmask (!%p296_p10), 1043459   ;;  %vm3652_vm7 = vcmask (!%p296_p10), 1044484  }
  0x12   : > { %v473_v10 = vunpack.c.0.s8 (!%p296_p10), %v472_v7  ;;  %v5102_v20 = vsub.s32 (!%p296_p10), 0, %v475_v11  ;;  %s4970_s11 = smov (!%p296_p10), 88   ;;  %s4971_s12 = smov (!%p296_p10), 72   ;;  %vm3655_vm8 = vcmask (!%p296_p10), 1045509   ;;  %vm3658_vm9 = vcmask (!%p296_p10), 1046534  }
  0x13   : > { %vm3661_vm10 = vcmask (!%p296_p10), 1047559   ;;  %vm3664_vm11 = vcmask (!%p296_p10), 130048   ;;  %vm3707_vm12 = vcmask (!%p296_p10), 261248   ;;  %vm3744_vm13 = vcmask (!%p296_p10), 392448  }
  0x14   : > { %368 = vperm.xlu0 (!%p296_p10), %4881, %v360_v3   ;;  %v476_v12 = vsub.s32 (!%p296_p10), %v473_v10, %v475_v11  ;;  %v5281_v11 = vld [vmem:[%s6349_s6] sm:$0xff] (!%p296_p10)  ;;  %vm3781_vm14 = vcmask (!%p296_p10), 523648   ;;  %vm3818_vm15 = vcmask (!%p296_p10), 654848  }
  0x15   : > { %4654 = vmatprep.mubr.msk.f32.mxu1 (!%p296_p10), %vm371_vm0, %v5281_v11 }
  0x16   : > { %s5087_s23 = scalar_select %p338_p11, %s4953_s30, 1 }
  0x18   : > { %s4546_s26 = sshll.u32 %s5087_s23, 3 }
  0x19   : > { %s350_s14 = scalar_lea.vmem %s6344_s1, %s4546_s26 }
  0x1a   : > { %v358_v4 = vld [vmem:[%s350_s14] sm:$0xff]  ;;  %s345_s14 = scalar_lea.vmem %s6343_s0, %s4546_s26 }
  0x1b   : > { %4647 = vmatprep.subr.mxu0 %v358_v4 }
  0x1c   : > { %4648 = vmatpush3.msra.mxu0 %v358_v4 }
  0x1d   : > { %4650 = vmatmul.mubr.msk.f32.vlgmr.msra.gmra.mrb[0].mxu0 %vm371_vm0, %v357_v5 }
  0x1e   : > { %4659 = vmatprep.mubr.msk.f32.mxu0 %vm371_vm0, %v5281_v11 }
  0x8f   : > { %v364_v9 = vpop.permute.xlu0 %363 }
  0x93   : > { %v369_v13 = vpop.permute.xlu0 %368 }
  0xf0   : > { %v4651_v14 = vpop.f32.mrb[0].mxu0 }
  0xf1   : > { %v450_v15 = vadd.f32 %v4651_v14, %v369_v13  ;;  %v444_v16 = vpop.f32.mrb[1].mxu0 }
  0xf2   : > { %v445_v17 = vadd.f32 %v444_v16, %v364_v9 }
  0xf3   : > { %v519_v18 = vcombine.high %v450_v15, %v450_v15  ;;  %v526_v19 = vrot.slane %v450_v15, %v476_v12 }
  0xf4   : > { %v456_v21 = vadd.f32 3.0, %v445_v17 }
  0xf5   : > { %v533_v22 = vrot.slane %v519_v18, %v476_v12  ;;  %v534_v23 = vcombine.high %v526_v19, %v526_v19  ;;  %v542_v24 = vrot.slane %v526_v19, %v476_v12 }
  0xf6   : > { %v458_v25 = vmax.f32 %v456_v21, 0.0 }
  0xf7   : > { %v535_v26 = vcombine.high %v533_v22, %v533_v22  ;;  %v5104_v27 = vrot.slane %v533_v22, %v476_v12  ;;  %v556_v28 = vrot.slane %v534_v23, %v476_v12  ;;  %v5106_v29 = vcombine.high %v542_v24, %v542_v24  ;;  %593 = vst.msk [vmem:[#allocation2 + $0x40] sm:$0x1] %vm584_vm1, %v542_v24 }
  0xf8   : > { %v636_v30 = vrot.slane %v542_v24, %v5102_v20  ;;  %v460_v31 = vmin.f32 %v458_v25, 6.0 }
  0xf9   : > { %v563_v32 = vrot.slane %v535_v26, %v476_v12  ;;  %v565_v33 = vcombine.high %v5104_v27, %v5104_v27  ;;  %v5112_v34 = vcombine.high %v556_v28, %v556_v28  ;;  %594 = vst.msk [vmem:[#allocation2 + $0x48] sm:$0x1] %vm584_vm1, %v556_v28  ;;  %595 = vst.msk [vmem:[#allocation2 + $0x50] sm:$0x1] %vm584_vm1, %v5106_v29 }
  0xfa   : > { %597 = vst.msk [vmem:[#allocation2 + $0x60] sm:$0x1] %vm584_vm1, %v5104_v27  ;;  %v462_v35 = vmul.f32 0.16666667, %v460_v31  ;;  %745 = vrot.lane.b32.xlu1 %v636_v30, %s4965_s20  ;;  %681 = vrot.lane.b32.xlu0 %v636_v30, %s4966_s21  ;;  %v640_v54 = vrot.slane %v556_v28, %v5102_v20  ;;  %v644_v62 = vrot.slane %v5106_v29, %v5102_v20 }
  0xfb   : > { %v567_v36 = vcombine.high %v563_v32, %v563_v32  ;;  %596 = vst.msk [vmem:[#allocation2 + $0x58] sm:$0x1] %vm584_vm1, %v5112_v34  ;;  %598 = vst.msk [vmem:[#allocation2 + $0x68] sm:$0x1] %vm584_vm1, %v563_v32  ;;  %v5126_v37 = vrot.slane %v563_v32, %v5102_v20  ;;  %v5129_v38 = vrot.slane %v565_v33, %v5102_v20 }
  0xfc   : > { %599 = vst.msk [vmem:[#allocation2 + $0x70] sm:$0x1] %vm584_vm1, %v565_v33  ;;  %v470_v39 = vcombine.high %v462_v35, %v462_v35  ;;  %v477_v40 = vrot.slane %v462_v35, %v476_v12  ;;  %v652_v63 = vrot.slane %v5104_v27, %v5102_v20  ;;  %v648_v0 = vrot.slane %v5112_v34, %v5102_v20 }
  0xfd   : > { %600 = vst.msk [vmem:[#allocation2 + $0x78] sm:$0x1] %vm584_vm1, %v567_v36  ;;  %v5133_v41 = vrot.slane %v567_v36, %v5102_v20 }
  0xfe   : > { %v484_v42 = vrot.slane %v470_v39, %v476_v12  ;;  %v485_v43 = vcombine.high %v477_v40, %v477_v40  ;;  %v493_v44 = vrot.slane %v477_v40, %v476_v12  ;;  %873 = vrot.lane.b32.xlu1 %v636_v30, %s4967_s22  ;;  %809 = vrot.lane.b32.xlu0 %v636_v30, %s4968_s24 }
 0x100   : > { %v486_v45 = vcombine.high %v484_v42, %v484_v42  ;;  %v500_v46 = vrot.slane %v484_v42, %v476_v12  ;;  %v507_v47 = vrot.slane %v485_v43, %v476_v12  ;;  %v515_v48 = vcombine.high %v493_v44, %v493_v44  ;;  %585 = vst.msk [vmem:[#allocation2] sm:$0x1] %vm584_vm1, %v493_v44 }
 0x101   : > { %v5139_v49 = vrot.slane %v493_v44, %v5102_v20 }
 0x102   : > { %v514_v50 = vrot.slane %v486_v45, %v476_v12  ;;  %v516_v51 = vcombine.high %v500_v46, %v500_v46  ;;  %v517_v52 = vcombine.high %v507_v47, %v507_v47  ;;  %586 = vst.msk [vmem:[#allocation2 + $0x8] sm:$0x1] %vm584_vm1, %v507_v47  ;;  %587 = vst.msk [vmem:[#allocation2 + $0x10] sm:$0x1] %vm584_vm1, %v515_v48  ;;  %1001 = vrot.lane.b32.xlu1 %v636_v30, %s4969_s25 }
 0x103   : > { %589 = vst.msk [vmem:[#allocation2 + $0x20] sm:$0x1] %vm584_vm1, %v500_v46  ;;  %v5145_v53 = vrot.slane %v507_v47, %v5102_v20  ;;  %v5150_v55 = vrot.slane %v515_v48, %v5102_v20  ;;  %v5153_v56 = vrot.slane %v500_v46, %v5102_v20  ;;  %937 = vrot.lane.b32.xlu0 %v636_v30, %s4970_s11 }
 0x104   : > { %v518_v57 = vcombine.high %v514_v50, %v514_v50  ;;  %588 = vst.msk [vmem:[#allocation2 + $0x18] sm:$0x1] %vm584_vm1, %v517_v52  ;;  %590 = vst.msk [vmem:[#allocation2 + $0x28] sm:$0x1] %vm584_vm1, %v514_v50  ;;  %v5160_v58 = vrot.slane %v517_v52, %v5102_v20  ;;  %v5163_v59 = vrot.slane %v514_v50, %v5102_v20 }
 0x105   : > { %591 = vst.msk [vmem:[#allocation2 + $0x30] sm:$0x1] %vm584_vm1, %v516_v51  ;;  %v5166_v60 = vrot.slane %v516_v51, %v5102_v20 }
 0x106   : > { %592 = vst.msk [vmem:[#allocation2 + $0x38] sm:$0x1] %vm584_vm1, %v518_v57  ;;  %v5170_v61 = vrot.slane %v518_v57, %v5102_v20  ;;  %683 = vrot.lane.b32.xlu1 %v640_v54, %s4966_s21 }
 0x107   : > { %1065 = vrot.lane.b32.xlu0 %v636_v30, %s4971_s12 }
 0x10a   : > { %811 = vrot.lane.b32.xlu1 %v640_v54, %s4968_s24 }
 0x10b   : > { %747 = vrot.lane.b32.xlu0 %v640_v54, %s4965_s20 }
 0x10e   : > { %939 = vrot.lane.b32.xlu1 %v640_v54, %s4970_s11 }
 0x10f   : > { %875 = vrot.lane.b32.xlu0 %v640_v54, %s4967_s22 }
 0x112   : > { %1067 = vrot.lane.b32.xlu1 %v640_v54, %s4971_s12 }
 0x113   : > { %1003 = vrot.lane.b32.xlu0 %v640_v54, %s4969_s25 }
 0x116   : > { %749 = vrot.lane.b32.xlu1 %v644_v62, %s4965_s20 }
 0x117   : > { %685 = vrot.lane.b32.xlu0 %v644_v62, %s4966_s21 }
 0x11a   : > { %877 = vrot.lane.b32.xlu1 %v644_v62, %s4967_s22 }
 0x11b   : > { %813 = vrot.lane.b32.xlu0 %v644_v62, %s4968_s24 }
 0x11e   : > { %1005 = vrot.lane.b32.xlu1 %v644_v62, %s4969_s25 }
 0x11f   : > { %941 = vrot.lane.b32.xlu0 %v644_v62, %s4970_s11 }
 0x122   : > { %753 = vrot.lane.b32.xlu1 %v652_v63, %s4965_s20 }
 0x123   : > { %1069 = vrot.lane.b32.xlu0 %v644_v62, %s4971_s12 }
 0x126   : > { %881 = vrot.lane.b32.xlu1 %v652_v63, %s4967_s22 }
 0x127   : > { %689 = vrot.lane.b32.xlu0 %v652_v63, %s4966_s21 }
 0x12a   : > { %1009 = vrot.lane.b32.xlu1 %v652_v63, %s4969_s25 }
 0x12b   : > { %817 = vrot.lane.b32.xlu0 %v652_v63, %s4968_s24 }
 0x12e   : > { %687 = vrot.lane.b32.xlu1 %v648_v0, %s4966_s21 }
 0x12f   : > { %945 = vrot.lane.b32.xlu0 %v652_v63, %s4970_s11 }
 0x132   : > { %815 = vrot.lane.b32.xlu1 %v648_v0, %s4968_s24 }
 0x133   : > { %1073 = vrot.lane.b32.xlu0 %v652_v63, %s4971_s12 }
 0x136   : > { %943 = vrot.lane.b32.xlu1 %v648_v0, %s4970_s11 }
 0x137   : > { %751 = vrot.lane.b32.xlu0 %v648_v0, %s4965_s20 }
 0x13a   : > { %1071 = vrot.lane.b32.xlu1 %v648_v0, %s4971_s12 }
 0x13b   : > { %879 = vrot.lane.b32.xlu0 %v648_v0, %s4967_s22 }
 0x13e   : > { %691 = vrot.lane.b32.xlu1 %v5126_v37, %s4966_s21 }
 0x13f   : > { %1007 = vrot.lane.b32.xlu0 %v648_v0, %s4969_s25  ;;  %v5434_v0 = vld [vmem:[%s6349_s6 + $0x8] sm:$0xff] }
 0x142   : > { %819 = vrot.lane.b32.xlu1 %v5126_v37, %s4968_s24 }
 0x143   : > { %755 = vrot.lane.b32.xlu0 %v5126_v37, %s4965_s20 }
 0x146   : > { %947 = vrot.lane.b32.xlu1 %v5126_v37, %s4970_s11 }
 0x147   : > { %883 = vrot.lane.b32.xlu0 %v5126_v37, %s4967_s22 }
 0x14a   : > { %1075 = vrot.lane.b32.xlu1 %v5126_v37, %s4971_s12 }
 0x14b   : > { %1011 = vrot.lane.b32.xlu0 %v5126_v37, %s4969_s25 }
 0x14e   : > { %757 = vrot.lane.b32.xlu1 %v5129_v38, %s4965_s20 }
 0x14f   : > { %693 = vrot.lane.b32.xlu0 %v5129_v38, %s4966_s21 }
 0x152   : > { %885 = vrot.lane.b32.xlu1 %v5129_v38, %s4967_s22 }
 0x153   : > { %821 = vrot.lane.b32.xlu0 %v5129_v38, %s4968_s24 }
 0x156   : > { %1013 = vrot.lane.b32.xlu1 %v5129_v38, %s4969_s25 }
 0x157   : > { %949 = vrot.lane.b32.xlu0 %v5129_v38, %s4970_s11 }
 0x15a   : > { %665 = vrot.lane.b32.xlu1 %v5139_v49, %s4966_s21 }
 0x15b   : > { %793 = vrot.lane.b32.xlu0 %v5139_v49, %s4968_s24 }
 0x15e   : > { %729 = vrot.lane.b32.xlu1 %v5139_v49, %s4965_s20 }
 0x15f   : > { %921 = vrot.lane.b32.xlu0 %v5139_v49, %s4970_s11 }
 0x162   : > { %857 = vrot.lane.b32.xlu1 %v5139_v49, %s4967_s22 }
 0x163   : > { %1049 = vrot.lane.b32.xlu0 %v5139_v49, %s4971_s12 }
 0x166   : > { %985 = vrot.lane.b32.xlu1 %v5139_v49, %s4969_s25 }
 0x167   : > { %731 = vrot.lane.b32.xlu0 %v5145_v53, %s4965_s20 }
 0x16a   : > { %667 = vrot.lane.b32.xlu1 %v5145_v53, %s4966_s21 }
 0x16b   : > { %859 = vrot.lane.b32.xlu0 %v5145_v53, %s4967_s22 }
 0x16c   : > { %v746_v1 = vpop.permute.xlu1 %745  ;;  %v682_v2 = vpop.permute.xlu0 %681 }
 0x16d   : > { %785 = vst.msk [vmem:[#allocation2 + $0x42] sm:$0x1] %vm584_vm1, %v746_v1  ;;  %721 = vst.msk [vmem:[#allocation2 + $0x41] sm:$0x1] %vm584_vm1, %v682_v2 }
 0x16e   : > { %795 = vrot.lane.b32.xlu1 %v5145_v53, %s4968_s24 }
 0x16f   : > { %987 = vrot.lane.b32.xlu0 %v5145_v53, %s4969_s25 }
 0x170   : > { %v874_v3 = vpop.permute.xlu1 %873  ;;  %v810_v4 = vpop.permute.xlu0 %809 }
 0x171   : > { %913 = vst.msk [vmem:[#allocation2 + $0x44] sm:$0x1] %vm584_vm1, %v874_v3  ;;  %849 = vst.msk [vmem:[#allocation2 + $0x43] sm:$0x1] %vm584_vm1, %v810_v4 }
 0x172   : > { %923 = vrot.lane.b32.xlu1 %v5145_v53, %s4970_s11 }
 0x173   : > { %669 = vrot.lane.b32.xlu0 %v5150_v55, %s4966_s21 }
 0x174   : > { %v1002_v5 = vpop.permute.xlu1 %1001 }
 0x175   : > { %1041 = vst.msk [vmem:[#allocation2 + $0x46] sm:$0x1] %vm584_vm1, %v1002_v5  ;;  %v938_v6 = vpop.permute.xlu0 %937 }
 0x176   : > { %977 = vst.msk [vmem:[#allocation2 + $0x45] sm:$0x1] %vm584_vm1, %v938_v6  ;;  %1051 = vrot.lane.b32.xlu1 %v5145_v53, %s4971_s12 }
 0x177   : > { %797 = vrot.lane.b32.xlu0 %v5150_v55, %s4968_s24 }
 0x178   : > { %v684_v7 = vpop.permute.xlu1 %683 }
 0x179   : > { %v1066_v8 = vpop.permute.xlu0 %1065  ;;  %722 = vst.msk [vmem:[#allocation2 + $0x49] sm:$0x1] %vm584_vm1, %v684_v7 }
 0x17a   : > { %1105 = vst.msk [vmem:[#allocation2 + $0x47] sm:$0x1] %vm584_vm1, %v1066_v8  ;;  %733 = vrot.lane.b32.xlu1 %v5150_v55, %s4965_s20 }
 0x17b   : > { %925 = vrot.lane.b32.xlu0 %v5150_v55, %s4970_s11 }
 0x17c   : > { %v812_v9 = vpop.permute.xlu1 %811 }
 0x17d   : > { %v748_v10 = vpop.permute.xlu0 %747  ;;  %850 = vst.msk [vmem:[#allocation2 + $0x4b] sm:$0x1] %vm584_vm1, %v812_v9 }
 0x17e   : > { %786 = vst.msk [vmem:[#allocation2 + $0x4a] sm:$0x1] %vm584_vm1, %v748_v10  ;;  %861 = vrot.lane.b32.xlu1 %v5150_v55, %s4967_s22 }
 0x17f   : > { %1053 = vrot.lane.b32.xlu0 %v5150_v55, %s4971_s12 }
 0x180   : > { %v940_v12 = vpop.permute.xlu1 %939 }
 0x181   : > { %v876_v13 = vpop.permute.xlu0 %875  ;;  %978 = vst.msk [vmem:[#allocation2 + $0x4d] sm:$0x1] %vm584_vm1, %v940_v12 }
 0x182   : > { %914 = vst.msk [vmem:[#allocation2 + $0x4c] sm:$0x1] %vm584_vm1, %v876_v13  ;;  %989 = vrot.lane.b32.xlu1 %v5150_v55, %s4969_s25 }
 0x183   : > { %673 = vrot.lane.b32.xlu0 %v5153_v56, %s4966_s21 }
 0x184   : > { %v1068_v14 = vpop.permute.xlu1 %1067 }
 0x185   : > { %v1004_v15 = vpop.permute.xlu0 %1003  ;;  %1106 = vst.msk [vmem:[#allocation2 + $0x4f] sm:$0x1] %vm584_vm1, %v1068_v14 }
 0x186   : > { %1042 = vst.msk [vmem:[#allocation2 + $0x4e] sm:$0x1] %vm584_vm1, %v1004_v15  ;;  %737 = vrot.lane.b32.xlu1 %v5153_v56, %s4965_s20 }
 0x187   : > { %801 = vrot.lane.b32.xlu0 %v5153_v56, %s4968_s24 }
 0x188   : > { %v750_v16 = vpop.permute.xlu1 %749 }
 0x189   : > { %v686_v17 = vpop.permute.xlu0 %685  ;;  %787 = vst.msk [vmem:[#allocation2 + $0x52] sm:$0x1] %vm584_vm1, %v750_v16 }
 0x18a   : > { %723 = vst.msk [vmem:[#allocation2 + $0x51] sm:$0x1] %vm584_vm1, %v686_v17  ;;  %865 = vrot.lane.b32.xlu1 %v5153_v56, %s4967_s22 }
 0x18b   : > { %929 = vrot.lane.b32.xlu0 %v5153_v56, %s4970_s11 }
 0x18c   : > { %v878_v18 = vpop.permute.xlu1 %877 }
 0x18d   : > { %v814_v19 = vpop.permute.xlu0 %813  ;;  %915 = vst.msk [vmem:[#allocation2 + $0x54] sm:$0x1] %vm584_vm1, %v878_v18 }
 0x18e   : > { %851 = vst.msk [vmem:[#allocation2 + $0x53] sm:$0x1] %vm584_vm1, %v814_v19  ;;  %993 = vrot.lane.b32.xlu1 %v5153_v56, %s4969_s25 }
 0x18f   : > { %1057 = vrot.lane.b32.xlu0 %v5153_v56, %s4971_s12  ;;  %v4251_v56 = vld [vmem:[%s6346_s3] sm:$0xff] }
 0x190   : > { %v1006_v20 = vpop.permute.xlu1 %1005 }
 0x191   : > { %v942_v21 = vpop.permute.xlu0 %941  ;;  %1043 = vst.msk [vmem:[#allocation2 + $0x56] sm:$0x1] %vm584_vm1, %v1006_v20 }
 0x192   : > { %979 = vst.msk [vmem:[#allocation2 + $0x55] sm:$0x1] %vm584_vm1, %v942_v21  ;;  %671 = vrot.lane.b32.xlu1 %v5160_v58, %s4966_s21 }
 0x193   : > { %735 = vrot.lane.b32.xlu0 %v5160_v58, %s4965_s20 }
 0x194   : > { %v754_v22 = vpop.permute.xlu1 %753 }
 0x195   : > { %v1070_v23 = vpop.permute.xlu0 %1069  ;;  %789 = vst.msk [vmem:[#allocation2 + $0x62] sm:$0x1] %vm584_vm1, %v754_v22 }
 0x196   : > { %1107 = vst.msk [vmem:[#allocation2 + $0x57] sm:$0x1] %vm584_vm1, %v1070_v23  ;;  %799 = vrot.lane.b32.xlu1 %v5160_v58, %s4968_s24 }
 0x197   : > { %863 = vrot.lane.b32.xlu0 %v5160_v58, %s4967_s22 }
 0x198   : > { %v882_v24 = vpop.permute.xlu1 %881 }
 0x199   : > { %917 = vst.msk [vmem:[#allocation2 + $0x64] sm:$0x1] %vm584_vm1, %v882_v24  ;;  %v690_v25 = vpop.permute.xlu0 %689 }
 0x19a   : > { %725 = vst.msk [vmem:[#allocation2 + $0x61] sm:$0x1] %vm584_vm1, %v690_v25  ;;  %927 = vrot.lane.b32.xlu1 %v5160_v58, %s4970_s11 }
 0x19b   : > { %991 = vrot.lane.b32.xlu0 %v5160_v58, %s4969_s25 }
 0x19c   : > { %v1010_v26 = vpop.permute.xlu1 %1009 }
 0x19d   : > { %1045 = vst.msk [vmem:[#allocation2 + $0x66] sm:$0x1] %vm584_vm1, %v1010_v26  ;;  %v818_v27 = vpop.permute.xlu0 %817 }
 0x19e   : > { %853 = vst.msk [vmem:[#allocation2 + $0x63] sm:$0x1] %vm584_vm1, %v818_v27  ;;  %1055 = vrot.lane.b32.xlu1 %v5160_v58, %s4971_s12 }
 0x19f   : > { %739 = vrot.lane.b32.xlu0 %v5163_v59, %s4965_s20 }
 0x1a0   : > { %v688_v28 = vpop.permute.xlu1 %687 }
 0x1a1   : > { %724 = vst.msk [vmem:[#allocation2 + $0x59] sm:$0x1] %vm584_vm1, %v688_v28  ;;  %v946_v29 = vpop.permute.xlu0 %945 }
 0x1a2   : > { %981 = vst.msk [vmem:[#allocation2 + $0x65] sm:$0x1] %vm584_vm1, %v946_v29  ;;  %675 = vrot.lane.b32.xlu1 %v5163_v59, %s4966_s21 }
 0x1a3   : > { %867 = vrot.lane.b32.xlu0 %v5163_v59, %s4967_s22 }
 0x1a4   : > { %v816_v30 = vpop.permute.xlu1 %815 }
 0x1a5   : > { %852 = vst.msk [vmem:[#allocation2 + $0x5b] sm:$0x1] %vm584_vm1, %v816_v30  ;;  %v1074_v31 = vpop.permute.xlu0 %1073 }
 0x1a6   : > { %1109 = vst.msk [vmem:[#allocation2 + $0x67] sm:$0x1] %vm584_vm1, %v1074_v31  ;;  %803 = vrot.lane.b32.xlu1 %v5163_v59, %s4968_s24 }
 0x1a7   : > { %995 = vrot.lane.b32.xlu0 %v5163_v59, %s4969_s25 }
 0x1a8   : > { %v944_v32 = vpop.permute.xlu1 %943 }
 0x1a9   : > { %980 = vst.msk [vmem:[#allocation2 + $0x5d] sm:$0x1] %vm584_vm1, %v944_v32  ;;  %v752_v33 = vpop.permute.xlu0 %751 }
 0x1aa   : > { %788 = vst.msk [vmem:[#allocation2 + $0x5a] sm:$0x1] %vm584_vm1, %v752_v33  ;;  %931 = vrot.lane.b32.xlu1 %v5163_v59, %s4970_s11 }
 0x1ab   : > { %677 = vrot.lane.b32.xlu0 %v5166_v60, %s4966_s21 }
 0x1ac   : > { %v1072_v34 = vpop.permute.xlu1 %1071 }
 0x1ad   : > { %1108 = vst.msk [vmem:[#allocation2 + $0x5f] sm:$0x1] %vm584_vm1, %v1072_v34  ;;  %v880_v35 = vpop.permute.xlu0 %879 }
 0x1ae   : > { %916 = vst.msk [vmem:[#allocation2 + $0x5c] sm:$0x1] %vm584_vm1, %v880_v35  ;;  %1059 = vrot.lane.b32.xlu1 %v5163_v59, %s4971_s12 }
 0x1af   : > { %805 = vrot.lane.b32.xlu0 %v5166_v60, %s4968_s24 }
 0x1b0   : > { %v692_v36 = vpop.permute.xlu1 %691 }
 0x1b1   : > { %v1008_v37 = vpop.permute.xlu0 %1007  ;;  %726 = vst.msk [vmem:[#allocation2 + $0x69] sm:$0x1] %vm584_vm1, %v692_v36 }
 0x1b2   : > { %1044 = vst.msk [vmem:[#allocation2 + $0x5e] sm:$0x1] %vm584_vm1, %v1008_v37  ;;  %741 = vrot.lane.b32.xlu1 %v5166_v60, %s4965_s20 }
 0x1b3   : > { %933 = vrot.lane.b32.xlu0 %v5166_v60, %s4970_s11 }
 0x1b4   : > { %v820_v39 = vpop.permute.xlu1 %819 }
 0x1b5   : > { %v756_v40 = vpop.permute.xlu0 %755  ;;  %854 = vst.msk [vmem:[#allocation2 + $0x6b] sm:$0x1] %vm584_vm1, %v820_v39 }
 0x1b6   : > { %790 = vst.msk [vmem:[#allocation2 + $0x6a] sm:$0x1] %vm584_vm1, %v756_v40  ;;  %869 = vrot.lane.b32.xlu1 %v5166_v60, %s4967_s22 }
 0x1b7   : > { %1061 = vrot.lane.b32.xlu0 %v5166_v60, %s4971_s12 }
 0x1b8   : > { %v948_v42 = vpop.permute.xlu1 %947 }
 0x1b9   : > { %v884_v43 = vpop.permute.xlu0 %883  ;;  %982 = vst.msk [vmem:[#allocation2 + $0x6d] sm:$0x1] %vm584_vm1, %v948_v42 }
 0x1ba   : > { %918 = vst.msk [vmem:[#allocation2 + $0x6c] sm:$0x1] %vm584_vm1, %v884_v43  ;;  %997 = vrot.lane.b32.xlu1 %v5166_v60, %s4969_s25 }
 0x1bb   : > { %743 = vrot.lane.b32.xlu0 %v5170_v61, %s4965_s20 }
 0x1bc   : > { %v1076_v44 = vpop.permute.xlu1 %1075 }
 0x1bd   : > { %v1012_v45 = vpop.permute.xlu0 %1011  ;;  %1110 = vst.msk [vmem:[#allocation2 + $0x6f] sm:$0x1] %vm584_vm1, %v1076_v44 }
 0x1be   : > { %1046 = vst.msk [vmem:[#allocation2 + $0x6e] sm:$0x1] %vm584_vm1, %v1012_v45  ;;  %679 = vrot.lane.b32.xlu1 %v5170_v61, %s4966_s21 }
 0x1bf   : > { %871 = vrot.lane.b32.xlu0 %v5170_v61, %s4967_s22 }
 0x1c0   : > { %v758_v46 = vpop.permute.xlu1 %757 }
 0x1c1   : > { %v694_v47 = vpop.permute.xlu0 %693  ;;  %791 = vst.msk [vmem:[#allocation2 + $0x72] sm:$0x1] %vm584_vm1, %v758_v46 }
 0x1c2   : > { %727 = vst.msk [vmem:[#allocation2 + $0x71] sm:$0x1] %vm584_vm1, %v694_v47  ;;  %807 = vrot.lane.b32.xlu1 %v5170_v61, %s4968_s24 }
 0x1c3   : > { %999 = vrot.lane.b32.xlu0 %v5170_v61, %s4969_s25 }
 0x1c4   : > { %v886_v48 = vpop.permute.xlu1 %885 }
 0x1c5   : > { %v822_v49 = vpop.permute.xlu0 %821  ;;  %919 = vst.msk [vmem:[#allocation2 + $0x74] sm:$0x1] %vm584_vm1, %v886_v48 }
 0x1c6   : > { %855 = vst.msk [vmem:[#allocation2 + $0x73] sm:$0x1] %vm584_vm1, %v822_v49  ;;  %935 = vrot.lane.b32.xlu1 %v5170_v61, %s4970_s11 }
 0x1c7   : > { %1077 = vrot.lane.b32.xlu0 %v5129_v38, %s4971_s12 }
 0x1c8   : > { %v1014_v50 = vpop.permute.xlu1 %1013 }
 0x1c9   : > { %v950_v51 = vpop.permute.xlu0 %949  ;;  %1047 = vst.msk [vmem:[#allocation2 + $0x76] sm:$0x1] %vm584_vm1, %v1014_v50 }
 0x1ca   : > { %983 = vst.msk [vmem:[#allocation2 + $0x75] sm:$0x1] %vm584_vm1, %v950_v51  ;;  %1063 = vrot.lane.b32.xlu1 %v5170_v61, %s4971_s12 }
 0x1cb   : > { %759 = vrot.lane.b32.xlu0 %v5133_v41, %s4965_s20 }
 0x1cc   : > { %v666_v52 = vpop.permute.xlu1 %665 }
 0x1cd   : > { %v794_v53 = vpop.permute.xlu0 %793  ;;  %713 = vst.msk [vmem:[#allocation2 + $0x1] sm:$0x1] %vm584_vm1, %v666_v52  ;;  %v1121_v52 = vld [vmem:[#allocation2 + $0x40] sm:$0xff] }
 0x1ce   : > { %841 = vst.msk [vmem:[#allocation2 + $0x3] sm:$0x1] %vm584_vm1, %v794_v53  ;;  %695 = vrot.lane.b32.xlu1 %v5133_v41, %s4966_s21  ;;  %s4973_s21 = smov 16  }
 0x1cf   : > { %887 = vrot.lane.b32.xlu0 %v5133_v41, %s4967_s22 }
 0x1d0   : > { %v730_v38 = vpop.permute.xlu1 %729 }
 0x1d1   : > { %v922_v54 = vpop.permute.xlu0 %921  ;;  %777 = vst.msk [vmem:[#allocation2 + $0x2] sm:$0x1] %vm584_vm1, %v730_v38  ;;  %v1123_v38 = vld [vmem:[#allocation2 + $0x50] sm:$0xff] }
 0x1d2   : > { %969 = vst.msk [vmem:[#allocation2 + $0x5] sm:$0x1] %vm584_vm1, %v922_v54  ;;  %823 = vrot.lane.b32.xlu1 %v5133_v41, %s4968_s24  ;;  %s4974_s24 = smov 32  }
 0x1d3   : > { %1015 = vrot.lane.b32.xlu0 %v5133_v41, %s4969_s25 }
 0x1d4   : > { %v858_v55 = vpop.permute.xlu1 %857 }
 0x1d5   : > { %v1050_v57 = vpop.permute.xlu0 %1049  ;;  %905 = vst.msk [vmem:[#allocation2 + $0x4] sm:$0x1] %vm584_vm1, %v858_v55  ;;  %v1125_v55 = vld [vmem:[#allocation2 + $0x60] sm:$0xff] }
 0x1d6   : > { %1097 = vst.msk [vmem:[#allocation2 + $0x7] sm:$0x1] %vm584_vm1, %v1050_v57  ;;  %951 = vrot.lane.b32.xlu1 %v5133_v41, %s4970_s11  ;;  %s4975_s11 = smov 48  }
 0x1d7   : > { %4254 = vperm.xlu0 %4881, %v4251_v56  }
 0x1d8   : > { %v986_v58 = vpop.permute.xlu1 %985 }
 0x1d9   : > { %1033 = vst.msk [vmem:[#allocation2 + $0x6] sm:$0x1] %vm584_vm1, %v986_v58  ;;  %v732_v59 = vpop.permute.xlu0 %731 }
 0x1da   : > { %778 = vst.msk [vmem:[#allocation2 + $0xa] sm:$0x1] %vm584_vm1, %v732_v59  ;;  %1079 = vrot.lane.b32.xlu1 %v5133_v41, %s4971_s12  ;;  %s4976_s12 = smov 64  }
 0x1dc   : > { %v668_v60 = vpop.permute.xlu1 %667 }
 0x1dd   : > { %v860_v61 = vpop.permute.xlu0 %859  ;;  %714 = vst.msk [vmem:[#allocation2 + $0x9] sm:$0x1] %vm584_vm1, %v668_v60 }
 0x1de   : > { %906 = vst.msk [vmem:[#allocation2 + $0xc] sm:$0x1] %vm584_vm1, %v860_v61  ;;  %v5525_v61 = vld [vmem:[%s6350_s7] sm:$0xff] }
 0x1e0   : > { %v796_v62 = vpop.permute.xlu1 %795  ;;  %v1113_v63 = vld [vmem:[#allocation2] sm:$0xff] }
 0x1e1   : > { %v988_v1 = vpop.permute.xlu0 %987  ;;  %842 = vst.msk [vmem:[#allocation2 + $0xb] sm:$0x1] %vm584_vm1, %v796_v62  ;;  %4652 = vmatprep.subr.mxu1 %v1113_v63 }
 0x1e2   : > { %1034 = vst.msk [vmem:[#allocation2 + $0xe] sm:$0x1] %vm584_vm1, %v988_v1  ;;  %4653 = vmatpush3.msra.mxu1 %v1113_v63 }
 0x1e3   : > { %4655 = vmatmul.mubr.msk.f32.vlgmr.msra.gmra.mrb[0].mxu1 %vm371_vm0, %v5434_v0 }
 0x1e4   : > { %v924_v41 = vpop.permute.xlu1 %923  ;;  %4664 = vmatprep.mubr.msk.f32.mxu1 %vm371_vm0, %v5281_v11 }
 0x1e5   : > { %v670_v2 = vpop.permute.xlu0 %669  ;;  %970 = vst.msk [vmem:[#allocation2 + $0xd] sm:$0x1] %vm584_vm1, %v924_v41  ;;  %v1122_v41 = vld [vmem:[#allocation2 + $0x48] sm:$0xff] }
 0x1e6   : > { %715 = vst.msk [vmem:[#allocation2 + $0x11] sm:$0x1] %vm584_vm1, %v670_v2 }
 0x1e8   : > { %v1052_v3 = vpop.permute.xlu1 %1051 }
 0x1e9   : > { %v798_v4 = vpop.permute.xlu0 %797  ;;  %1098 = vst.msk [vmem:[#allocation2 + $0xf] sm:$0x1] %vm584_vm1, %v1052_v3  ;;  %v1124_v3 = vld [vmem:[#allocation2 + $0x58] sm:$0xff] }
 0x1ea   : > { %843 = vst.msk [vmem:[#allocation2 + $0x13] sm:$0x1] %vm584_vm1, %v798_v4 }
 0x1ec   : > { %v734_v5 = vpop.permute.xlu1 %733 }
 0x1ed   : > { %v926_v6 = vpop.permute.xlu0 %925  ;;  %779 = vst.msk [vmem:[#allocation2 + $0x12] sm:$0x1] %vm584_vm1, %v734_v5  ;;  %v1126_v5 = vld [vmem:[#allocation2 + $0x68] sm:$0xff] }
 0x1ee   : > { %971 = vst.msk [vmem:[#allocation2 + $0x15] sm:$0x1] %vm584_vm1, %v926_v6 }
 0x1f0   : > { %v862_v7 = vpop.permute.xlu1 %861  ;;  %v1114_v8 = vld [vmem:[#allocation2 + $0x8] sm:$0xff] }
 0x1f1   : > { %v1054_v9 = vpop.permute.xlu0 %1053  ;;  %907 = vst.msk [vmem:[#allocation2 + $0x14] sm:$0x1] %vm584_vm1, %v862_v7  ;;  %4657 = vmatprep.subr.mxu0 %v1114_v8 }
 0x1f2   : > { %1099 = vst.msk [vmem:[#allocation2 + $0x17] sm:$0x1] %vm584_vm1, %v1054_v9  ;;  %4658 = vmatpush3.msra.mxu0 %v1114_v8 }
 0x1f3   : > { %4660 = vmatmul.mubr.msk.f32.vlgmr.msra.gmra.mrb[2].mxu0 %vm371_vm0, %v5434_v0 }
 0x1f4   : > { %v990_v10 = vpop.permute.xlu1 %989  ;;  %4669 = vmatprep.mubr.msk.f32.mxu0 %vm371_vm0, %v5281_v11 }
 0x1f5   : > { %1035 = vst.msk [vmem:[#allocation2 + $0x16] sm:$0x1] %vm584_vm1, %v990_v10  ;;  %v674_v12 = vpop.permute.xlu0 %673 }
 0x1f6   : > { %717 = vst.msk [vmem:[#allocation2 + $0x21] sm:$0x1] %vm584_vm1, %v674_v12 }
 0x1f8   : > { %v738_v13 = vpop.permute.xlu1 %737 }
 0x1f9   : > { %781 = vst.msk [vmem:[#allocation2 + $0x22] sm:$0x1] %vm584_vm1, %v738_v13  ;;  %v802_v14 = vpop.permute.xlu0 %801 }
 0x1fa   : > { %845 = vst.msk [vmem:[#allocation2 + $0x23] sm:$0x1] %vm584_vm1, %v802_v14 }
 0x1fc   : > { %v866_v15 = vpop.permute.xlu1 %865  ;;  %v1115_v16 = vld [vmem:[#allocation2 + $0x10] sm:$0xff] }
 0x1fd   : > { %909 = vst.msk [vmem:[#allocation2 + $0x24] sm:$0x1] %vm584_vm1, %v866_v15  ;;  %v930_v17 = vpop.permute.xlu0 %929  ;;  %4662 = vmatprep.subr.mxu1 %v1115_v16 }
 0x1fe   : > { %973 = vst.msk [vmem:[#allocation2 + $0x25] sm:$0x1] %vm584_vm1, %v930_v17  ;;  %4663 = vmatpush3.msra.mxu1 %v1115_v16 }
 0x1ff   : > { %4665 = vmatmul.mubr.msk.f32.vlgmr.msra.gmra.mrb[2].mxu1 %vm371_vm0, %v5434_v0 }
 0x200   : > { %v994_v18 = vpop.permute.xlu1 %993  ;;  %4674 = vmatprep.mubr.msk.f32.mxu1 %vm371_vm0, %v5281_v11 }
 0x201   : > { %1037 = vst.msk [vmem:[#allocation2 + $0x26] sm:$0x1] %vm584_vm1, %v994_v18  ;;  %v1058_v19 = vpop.permute.xlu0 %1057 }
 0x202   : > { %1101 = vst.msk [vmem:[#allocation2 + $0x27] sm:$0x1] %vm584_vm1, %v1058_v19 }
 0x204   : > { %v672_v20 = vpop.permute.xlu1 %671 }
 0x205   : > { %716 = vst.msk [vmem:[#allocation2 + $0x19] sm:$0x1] %vm584_vm1, %v672_v20  ;;  %v736_v21 = vpop.permute.xlu0 %735 }
 0x206   : > { %780 = vst.msk [vmem:[#allocation2 + $0x1a] sm:$0x1] %vm584_vm1, %v736_v21 }
 0x208   : > { %v800_v22 = vpop.permute.xlu1 %799 }
 0x209   : > { %844 = vst.msk [vmem:[#allocation2 + $0x1b] sm:$0x1] %vm584_vm1, %v800_v22  ;;  %v864_v23 = vpop.permute.xlu0 %863  ;;  %v1117_v24 = vld [vmem:[#allocation2 + $0x20] sm:$0xff] }
 0x20a   : > { %908 = vst.msk [vmem:[#allocation2 + $0x1c] sm:$0x1] %vm584_vm1, %v864_v23  ;;  %4672 = vmatprep.subr.mxu1 %v1117_v24 }
 0x20b   : > { %4673 = vmatpush3.msra.mxu1 %v1117_v24  ;;  %v4250_v24 = vld [vmem:[%s345_s14] sm:$0xff] }
 0x20c   : > { %v928_v25 = vpop.permute.xlu1 %927  ;;  %4675 = vmatmul.mubr.msk.f32.vlgmr.msra.gmra.mrb[4].mxu1 %vm371_vm0, %v5434_v0 }
 0x20d   : > { %972 = vst.msk [vmem:[#allocation2 + $0x1d] sm:$0x1] %vm584_vm1, %v928_v25  ;;  %v992_v26 = vpop.permute.xlu0 %991  ;;  %4684 = vmatprep.mubr.msk.f32.mxu1 %vm371_vm0, %v5281_v11 }
 0x20e   : > { %1036 = vst.msk [vmem:[#allocation2 + $0x1e] sm:$0x1] %vm584_vm1, %v992_v26  ;;  %v4258_v26 = vcombine.high %v4250_v24, %v4250_v24 }
 0x210   : > { %v1056_v27 = vpop.permute.xlu1 %1055 }
 0x211   : > { %1100 = vst.msk [vmem:[#allocation2 + $0x1f] sm:$0x1] %vm584_vm1, %v1056_v27  ;;  %v740_v28 = vpop.permute.xlu0 %739 }
 0x212   : > { %782 = vst.msk [vmem:[#allocation2 + $0x2a] sm:$0x1] %vm584_vm1, %v740_v28 }
 0x214   : > { %v676_v29 = vpop.permute.xlu1 %675 }
 0x215   : > { %v868_v30 = vpop.permute.xlu0 %867  ;;  %718 = vst.msk [vmem:[#allocation2 + $0x29] sm:$0x1] %vm584_vm1, %v676_v29 }
 0x216   : > { %910 = vst.msk [vmem:[#allocation2 + $0x2c] sm:$0x1] %vm584_vm1, %v868_v30 }
 0x218   : > { %v804_v31 = vpop.permute.xlu1 %803  ;;  %v1116_v32 = vld [vmem:[#allocation2 + $0x18] sm:$0xff] }
 0x219   : > { %v996_v33 = vpop.permute.xlu0 %995  ;;  %846 = vst.msk [vmem:[#allocation2 + $0x2b] sm:$0x1] %vm584_vm1, %v804_v31  ;;  %4667 = vmatprep.subr.mxu0 %v1116_v32 }
 0x21a   : > { %1038 = vst.msk [vmem:[#allocation2 + $0x2e] sm:$0x1] %vm584_vm1, %v996_v33  ;;  %4668 = vmatpush3.msra.mxu0 %v1116_v32 }
 0x21b   : > { %4670 = vmatmul.mubr.msk.f32.vlgmr.msra.gmra.mrb[4].mxu0 %vm371_vm0, %v5434_v0 }
 0x21c   : > { %v932_v34 = vpop.permute.xlu1 %931  ;;  %4679 = vmatprep.mubr.msk.f32.mxu0 %vm371_vm0, %v5281_v11 }
 0x21d   : > { %v678_v35 = vpop.permute.xlu0 %677  ;;  %974 = vst.msk [vmem:[#allocation2 + $0x2d] sm:$0x1] %vm584_vm1, %v932_v34  ;;  %v4972_v34 = vmov 0.0  }
 0x21e   : > { %719 = vst.msk [vmem:[#allocation2 + $0x31] sm:$0x1] %vm584_vm1, %v678_v35  ;;  %v4249_v35 = vld [vmem:[%s6345_s2] sm:$0xff] }
 0x220   : > { %v1060_v36 = vpop.permute.xlu1 %1059 }
 0x221   : > { %v806_v37 = vpop.permute.xlu0 %805  ;;  %1102 = vst.msk [vmem:[#allocation2 + $0x2f] sm:$0x1] %vm584_vm1, %v1060_v36 }
 0x222   : > { %847 = vst.msk [vmem:[#allocation2 + $0x33] sm:$0x1] %vm584_vm1, %v806_v37 }
 0x224   : > { %v742_v39 = vpop.permute.xlu1 %741 }
 0x225   : > { %v934_v40 = vpop.permute.xlu0 %933  ;;  %783 = vst.msk [vmem:[#allocation2 + $0x32] sm:$0x1] %vm584_vm1, %v742_v39 }
 0x226   : > { %975 = vst.msk [vmem:[#allocation2 + $0x35] sm:$0x1] %vm584_vm1, %v934_v40 }
 0x228   : > { %v870_v42 = vpop.permute.xlu1 %869  ;;  %v1118_v43 = vld [vmem:[#allocation2 + $0x28] sm:$0xff] }
 0x229   : > { %v1062_v44 = vpop.permute.xlu0 %1061  ;;  %911 = vst.msk [vmem:[#allocation2 + $0x34] sm:$0x1] %vm584_vm1, %v870_v42  ;;  %4677 = vmatprep.subr.mxu0 %v1118_v43 }
 0x22a   : > { %1103 = vst.msk [vmem:[#allocation2 + $0x37] sm:$0x1] %vm584_vm1, %v1062_v44  ;;  %4678 = vmatpush3.msra.mxu0 %v1118_v43 }
 0x22b   : > { %4680 = vmatmul.mubr.msk.f32.vlgmr.msra.gmra.mrb[6].mxu0 %vm371_vm0, %v5434_v0 }
 0x22c   : > { %v998_v45 = vpop.permute.xlu1 %997  ;;  %4689 = vmatprep.mubr.msk.f32.mxu0 %vm371_vm0, %v5281_v11 }
 0x22d   : > { %1039 = vst.msk [vmem:[#allocation2 + $0x36] sm:$0x1] %vm584_vm1, %v998_v45  ;;  %v744_v46 = vpop.permute.xlu0 %743 }
 0x22e   : > { %784 = vst.msk [vmem:[#allocation2 + $0x3a] sm:$0x1] %vm584_vm1, %v744_v46 }
 0x230   : > { %v680_v47 = vpop.permute.xlu1 %679 }
 0x231   : > { %v872_v48 = vpop.permute.xlu0 %871  ;;  %720 = vst.msk [vmem:[#allocation2 + $0x39] sm:$0x1] %vm584_vm1, %v680_v47 }
 0x232   : > { %912 = vst.msk [vmem:[#allocation2 + $0x3c] sm:$0x1] %vm584_vm1, %v872_v48 }
 0x234   : > { %v808_v49 = vpop.permute.xlu1 %807  ;;  %v1119_v50 = vld [vmem:[#allocation2 + $0x30] sm:$0xff] }
 0x235   : > { %v1000_v51 = vpop.permute.xlu0 %999  ;;  %848 = vst.msk [vmem:[#allocation2 + $0x3b] sm:$0x1] %vm584_vm1, %v808_v49  ;;  %4682 = vmatprep.subr.mxu1 %v1119_v50 }
 0x236   : > { %1040 = vst.msk [vmem:[#allocation2 + $0x3e] sm:$0x1] %vm584_vm1, %v1000_v51  ;;  %4683 = vmatpush3.msra.mxu1 %v1119_v50 }
 0x237   : > { %4685 = vmatmul.mubr.msk.f32.vlgmr.msra.gmra.mrb[6].mxu1 %vm371_vm0, %v5434_v0  ;;  %4692 = vmatprep.subr.mxu1 %v1121_v52 }
 0x238   : > { %4693 = vmatpush3.msra.mxu1 %v1121_v52  ;;  %v936_v53 = vpop.permute.xlu1 %935  ;;  %4694 = vmatprep.mubr.msk.f32.mxu1 %vm371_vm0, %v5281_v11 }
 0x239   : > { %v1078_v54 = vpop.permute.xlu0 %1077  ;;  %976 = vst.msk [vmem:[#allocation2 + $0x3d] sm:$0x1] %vm584_vm1, %v936_v53  ;;  %4702 = vmatprep.subr.mxu1 %v1123_v38 }
 0x23a   : > { %1111 = vst.msk [vmem:[#allocation2 + $0x77] sm:$0x1] %vm584_vm1, %v1078_v54 }
 0x23b   : > { %4695 = vmatmul.mubr.msk.f32.vlgmr.msra.gmra.mrb[8].mxu1 %vm371_vm0, %v5434_v0 }
 0x23c   : > { %4703 = vmatpush3.msra.mxu1 %v1123_v38  ;;  %v1064_v56 = vpop.permute.xlu1 %1063  ;;  %4704 = vmatprep.mubr.msk.f32.mxu1 %vm371_vm0, %v5281_v11 }
 0x23d   : > { %4712 = vmatprep.subr.mxu1 %v1125_v55  ;;  %v760_v57 = vpop.permute.xlu0 %759  ;;  %1104 = vst.msk [vmem:[#allocation2 + $0x3f] sm:$0x1] %vm584_vm1, %v1064_v56 }
 0x23e   : > { %792 = vst.msk [vmem:[#allocation2 + $0x7a] sm:$0x1] %vm584_vm1, %v760_v57 }
 0x23f   : > { %4705 = vmatmul.mubr.msk.f32.vlgmr.msra.gmra.mrb[10].mxu1 %vm371_vm0, %v5434_v0 }
 0x240   : > { %4713 = vmatpush3.msra.mxu1 %v1125_v55  ;;  %v696_v58 = vpop.permute.xlu1 %695  ;;  %4714 = vmatprep.mubr.msk.f32.mxu1 %vm371_vm0, %v5281_v11 }
 0x241   : > { %v888_v59 = vpop.permute.xlu0 %887  ;;  %728 = vst.msk [vmem:[#allocation2 + $0x79] sm:$0x1] %vm584_vm1, %v696_v58  ;;  %v1127_v60 = vld [vmem:[#allocation2 + $0x70] sm:$0xff] }
 0x242   : > { %920 = vst.msk [vmem:[#allocation2 + $0x7c] sm:$0x1] %vm584_vm1, %v888_v59  ;;  %4722 = vmatprep.subr.mxu1 %v1127_v60 }
 0x243   : > { %4715 = vmatmul.mubr.msk.f32.vlgmr.msra.gmra.mrb[12].mxu1 %vm371_vm0, %v5434_v0 }
 0x244   : > { %4723 = vmatpush3.msra.mxu1 %v1127_v60  ;;  %v824_v62 = vpop.permute.xlu1 %823  ;;  %v1120_v63 = vld [vmem:[#allocation2 + $0x38] sm:$0xff]  ;;  %4724 = vmatprep.mubr.msk.f32.mxu1 %vm371_vm0, %v5281_v11 }
 0x245   : > { %v1016_v1 = vpop.permute.xlu0 %1015  ;;  %856 = vst.msk [vmem:[#allocation2 + $0x7b] sm:$0x1] %vm584_vm1, %v824_v62  ;;  %4687 = vmatprep.subr.mxu0 %v1120_v63  ;;  %4732 = vmatprep.subr.mxu1 %v5525_v61 }
 0x246   : > { %1048 = vst.msk [vmem:[#allocation2 + $0x7e] sm:$0x1] %vm584_vm1, %v1016_v1  ;;  %4688 = vmatpush3.msra.mxu0 %v1120_v63 }
 0x247   : > { %4690 = vmatmul.mubr.msk.f32.vlgmr.msra.gmra.mrb[8].mxu0 %vm371_vm0, %v5434_v0  ;;  %4697 = vmatprep.subr.mxu0 %v1122_v41 }
 0x248   : > { %4725 = vmatmul.mubr.msk.f32.vlgmr.msra.gmra.mrb[14].mxu1 %vm371_vm0, %v5434_v0  ;;  %v952_v2 = vpop.permute.xlu1 %951  ;;  %4698 = vmatpush3.msra.mxu0 %v1122_v41 }
 0x249   : > { %984 = vst.msk [vmem:[#allocation2 + $0x7d] sm:$0x1] %vm584_vm1, %v952_v2  ;;  %4707 = vmatprep.subr.mxu0 %v1124_v3  ;;  %4699 = vmatprep.mubr.msk.f32.mxu0 %vm371_vm0, %v5281_v11 }
 0x24a   : > { %4733 = vmatpush3.msra.mxu1 %v5525_v61 }
 0x24b   : > { %4700 = vmatmul.mubr.msk.f32.vlgmr.msra.gmra.mrb[10].mxu0 %vm371_vm0, %v5434_v0  ;;  %4742 = vmatprep.subr.mxu1 %v5525_v61 }
 0x24c   : > { %4708 = vmatpush3.msra.mxu0 %v1124_v3  ;;  %v1080_v4 = vpop.permute.xlu1 %1079  ;;  %4709 = vmatprep.mubr.msk.f32.mxu0 %vm371_vm0, %v5281_v11 }
 0x24d   : > { %1112 = vst.msk [vmem:[#allocation2 + $0x7f] sm:$0x1] %vm584_vm1, %v1080_v4  ;;  %4717 = vmatprep.subr.mxu0 %v1126_v5  ;;  %vm3892_vm1 = vcmask 917248  }
 0x24f   : > { %4710 = vmatmul.mubr.msk.f32.vlgmr.msra.gmra.mrb[12].mxu0 %vm371_vm0, %v5434_v0 }
 0x250   : > { %4718 = vmatpush3.msra.mxu0 %v1126_v5  ;;  %4719 = vmatprep.mubr.msk.f32.mxu0 %vm371_vm0, %v5281_v11 }
 0x253   : > { %4720 = vmatmul.mubr.msk.f32.vlgmr.msra.gmra.mrb[14].mxu0 %vm371_vm0, %v5434_v0 }
 0x254   : > { %v1128_v6 = vld [vmem:[#allocation2 + $0x78] sm:$0xff]  ;;  %4729 = vmatprep.mubr.msk.f32.mxu0 %vm371_vm0, %v5281_v11 }
 0x255   : > { %4727 = vmatprep.subr.mxu0 %v1128_v6 }
 0x256   : > { %4728 = vmatpush3.msra.mxu0 %v1128_v6 }
 0x257   : > { %4730 = vmatmul.mubr.msk.f32.vlgmr.msra.gmra.mrb[16].mxu0 %vm371_vm0, %v5434_v0  ;;  %4737 = vmatprep.subr.mxu0 %v5525_v61 }
 0x258   : > { %4738 = vmatpush3.msra.mxu0 %v5525_v61 }
 0x259   : > { %4747 = vmatprep.subr.mxu0 %v5525_v61 }
 0x2b6   : > { %v4656_v7 = vpop.f32.mrb[0].mxu1 }
 0x2b7   : > { %v1203_v8 = vpop.f32.mrb[1].mxu1 }
 0x2b8   : > { %4734 = vmatprep.mubr.msk.f32.mxu1 %vm371_vm0, %v1203_v8 }
 0x2b9   : > { %4735 = vmatmul.mubr.msk.f32.vlgmr.msra.gmra.mrb[16].mxu1 %vm371_vm0, %v4656_v7 }
 0x2ba   : > { %4743 = vmatpush3.msra.mxu1 %v5525_v61 }
 0x2bb   : > { %4752 = vmatprep.subr.mxu1 %v5525_v61 }
 0x2c6   : > { %v4661_v11 = vpop.f32.mrb[2].mxu0 }
 0x2c7   : > { %v1278_v9 = vpop.f32.mrb[3].mxu0 }
 0x2c8   : > { %4739 = vmatprep.mubr.msk.f32.mxu0 %vm371_vm0, %v1278_v9 }
 0x2c9   : > { %4740 = vmatmul.mubr.msk.f32.vlgmr.msra.gmra.mrb[18].mxu0 %vm371_vm0, %v4661_v11 }
 0x2ca   : > { %4748 = vmatpush3.msra.mxu0 %v5525_v61 }
 0x2cb   : > { %4757 = vmatprep.subr.mxu0 %v5525_v61 }
 0x2d2   : > { %v4666_v0 = vpop.f32.mrb[2].mxu1 }
 0x2d3   : > { %v1353_v10 = vpop.f32.mrb[3].mxu1 }
 0x2d4   : > { %4744 = vmatprep.mubr.msk.f32.mxu1 %vm371_vm0, %v1353_v10 }
 0x2d5   : > { %4745 = vmatmul.mubr.msk.f32.vlgmr.msra.gmra.mrb[18].mxu1 %vm371_vm0, %v4666_v0 }
 0x2d6   : > { %4753 = vmatpush3.msra.mxu1 %v5525_v61 }
 0x2d7   : > { %4762 = vmatprep.subr.mxu1 %v5525_v61 }
 0x2df   : > { %v4676_v12 = vpop.f32.mrb[4].mxu1 }
 0x2e0   : > { %v1503_v13 = vpop.f32.mrb[5].mxu1 }
 0x2e1   : > { %4754 = vmatprep.mubr.msk.f32.mxu1 %vm371_vm0, %v1503_v13 }
 0x2e2   : > { %4755 = vmatmul.mubr.msk.f32.vlgmr.msra.gmra.mrb[20].mxu1 %vm371_vm0, %v4676_v12 }
 0x2e3   : > { %4763 = vmatpush3.msra.mxu1 %v5525_v61 }
 0x2e4   : > { %4772 = vmatprep.subr.mxu1 %v5525_v61 }
 0x2ee   : > { %v4671_v14 = vpop.f32.mrb[4].mxu0 }
 0x2ef   : > { %v1428_v15 = vpop.f32.mrb[5].mxu0 }
 0x2f0   : > { %4749 = vmatprep.mubr.msk.f32.mxu0 %vm371_vm0, %v1428_v15 }
 0x2f1   : > { %4750 = vmatmul.mubr.msk.f32.vlgmr.msra.gmra.mrb[20].mxu0 %vm371_vm0, %v4671_v14 }
 0x2f2   : > { %4758 = vmatpush3.msra.mxu0 %v5525_v61 }
 0x2f3   : > { %4767 = vmatprep.subr.mxu0 %v5525_v61 }
 0x2fe   : > { %v4681_v16 = vpop.f32.mrb[6].mxu0 }
 0x2ff   : > { %v1578_v17 = vpop.f32.mrb[7].mxu0 }
 0x300   : > { %4759 = vmatprep.mubr.msk.f32.mxu0 %vm371_vm0, %v1578_v17 }
 0x301   : > { %4760 = vmatmul.mubr.msk.f32.vlgmr.msra.gmra.mrb[22].mxu0 %vm371_vm0, %v4681_v16 }
 0x302   : > { %4768 = vmatpush3.msra.mxu0 %v5525_v61 }
 0x303   : > { %4777 = vmatprep.subr.mxu0 %v5525_v61 }
 0x30a   : > { %v4686_v18 = vpop.f32.mrb[6].mxu1 }
 0x30b   : > { %v1653_v19 = vpop.f32.mrb[7].mxu1 }
 0x30c   : > { %4764 = vmatprep.mubr.msk.f32.mxu1 %vm371_vm0, %v1653_v19 }
 0x30d   : > { %4765 = vmatmul.mubr.msk.f32.vlgmr.msra.gmra.mrb[22].mxu1 %vm371_vm0, %v4686_v18 }
 0x30e   : > { %v4696_v20 = vpop.f32.mrb[8].mxu1  ;;  %4773 = vmatpush3.msra.mxu1 %v5525_v61 }
 0x30f   : > { %v1803_v21 = vpop.f32.mrb[9].mxu1  ;;  %4782 = vmatprep.subr.mxu1 %v5525_v61 }
 0x310   : > { %4774 = vmatprep.mubr.msk.f32.mxu1 %vm371_vm0, %v1803_v21 }
 0x311   : > { %4775 = vmatmul.mubr.msk.f32.vlgmr.msra.gmra.mrb[24].mxu1 %vm371_vm0, %v4696_v20 }
 0x312   : > { %v4706_v22 = vpop.f32.mrb[10].mxu1  ;;  %4783 = vmatpush3.msra.mxu1 %v5525_v61 }
 0x313   : > { %v1953_v23 = vpop.f32.mrb[11].mxu1  ;;  %4792 = vmatprep.subr.mxu1 %v5525_v61 }
 0x314   : > { %4784 = vmatprep.mubr.msk.f32.mxu1 %vm371_vm0, %v1953_v23 }
 0x315   : > { %4785 = vmatmul.mubr.msk.f32.vlgmr.msra.gmra.mrb[26].mxu1 %vm371_vm0, %v4706_v22 }
 0x316   : > { %v4716_v25 = vpop.f32.mrb[12].mxu1  ;;  %4793 = vmatpush3.msra.mxu1 %v5525_v61 }
 0x317   : > { %v2103_v27 = vpop.f32.mrb[13].mxu1  ;;  %4802 = vmatprep.subr.mxu1 %v5525_v61 }
 0x318   : > { %4794 = vmatprep.mubr.msk.f32.mxu1 %vm371_vm0, %v2103_v27 }
 0x319   : > { %4795 = vmatmul.mubr.msk.f32.vlgmr.msra.gmra.mrb[28].mxu1 %vm371_vm0, %v4716_v25 }
 0x31a   : > { %v4691_v28 = vpop.f32.mrb[8].mxu0  ;;  %4803 = vmatpush3.msra.mxu1 %v5525_v61 }
 0x31b   : > { %v4726_v29 = vpop.f32.mrb[14].mxu1  ;;  %v1728_v30 = vpop.f32.mrb[9].mxu0  ;;  %4538 = vmatprep.subr.msk.mxu1 %vm4263_vm2, %v4258_v26 }
 0x31c   : > { %v2253_v31 = vpop.f32.mrb[15].mxu1  ;;  %4769 = vmatprep.mubr.msk.f32.mxu0 %vm371_vm0, %v1728_v30 }
 0x31d   : > { %4804 = vmatprep.mubr.msk.f32.mxu1 %vm371_vm0, %v2253_v31  ;;  %4770 = vmatmul.mubr.msk.f32.vlgmr.msra.gmra.mrb[24].mxu0 %vm371_vm0, %v4691_v28 }
 0x31e   : > { %4805 = vmatmul.mubr.msk.f32.vlgmr.msra.gmra.mrb[30].mxu1 %vm371_vm0, %v4726_v29  ;;  %v4701_v32 = vpop.f32.mrb[10].mxu0  ;;  %4778 = vmatpush3.msra.mxu0 %v5525_v61 }
 0x31f   : > { %v1878_v33 = vpop.f32.mrb[11].mxu0  ;;  %4539 = vmatpush1.msk.msra.mxu1 %vm4263_vm2, %v4250_v24  ;;  %4332 = vmatprep.mubr.f32.mxu1 %v4972_v34  ;;  %vm3929_vm2 = vcmask 1048448  }
 0x320   : > { %4779 = vmatprep.mubr.msk.f32.mxu0 %vm371_vm0, %v1878_v33  ;;  %4787 = vmatprep.subr.mxu0 %v5525_v61 }
 0x321   : > { %4780 = vmatmul.mubr.msk.f32.vlgmr.msra.gmra.mrb[26].mxu0 %vm371_vm0, %v4701_v32 }
 0x322   : > { %4540 = vmatmul.mubr.msk.f32.vlgmr.msra.gmra.mrb[32].mxu1 %vm4259_vm3, %v4249_v35  ;;  %v4711_v36 = vpop.f32.mrb[12].mxu0  ;;  %4788 = vmatpush3.msra.mxu0 %v5525_v61 }
 0x323   : > { %v2028_v37 = vpop.f32.mrb[13].mxu0  ;;  %4797 = vmatprep.subr.mxu0 %v5525_v61 }
 0x324   : > { %4789 = vmatprep.mubr.msk.f32.mxu0 %vm371_vm0, %v2028_v37 }
 0x325   : > { %4790 = vmatmul.mubr.msk.f32.vlgmr.msra.gmra.mrb[28].mxu0 %vm371_vm0, %v4711_v36 }
 0x326   : > { %v4721_v39 = vpop.f32.mrb[14].mxu0  ;;  %4798 = vmatpush3.msra.mxu0 %v5525_v61 }
 0x327   : > { %v2178_v40 = vpop.f32.mrb[15].mxu0  ;;  %4807 = vmatprep.subr.mxu0 %v5525_v61 }
 0x328   : > { %4799 = vmatprep.mubr.msk.f32.mxu0 %vm371_vm0, %v2178_v40 }
 0x329   : > { %4800 = vmatmul.mubr.msk.f32.vlgmr.msra.gmra.mrb[30].mxu0 %vm371_vm0, %v4721_v39 }
 0x32a   : > { %v4731_v42 = vpop.f32.mrb[16].mxu0  ;;  %4808 = vmatpush3.msra.mxu0 %v5525_v61 }
 0x32b   : > { %v2328_v43 = vpop.f32.mrb[17].mxu0 }
 0x32c   : > { %4809 = vmatprep.mubr.msk.f32.mxu0 %vm371_vm0, %v2328_v43 }
 0x32d   : > { %4810 = vmatmul.mubr.msk.f32.vlgmr.msra.gmra.mrb[32].mxu0 %vm371_vm0, %v4731_v42  ;;  %vm3855_vm0 = vcmask 786048  }
 0x38c   : > { %v4736_v44 = vpop.f32.mrb[16].mxu1 }
 0x38d   : > { %v2410_v45 = vpop.f32.mrb[17].mxu1  ;;  %v3997_v46 = vrot.slane %v4736_v44, 1  ;;  %v4033_v47 = vrot.slane %v4736_v44, 2  ;;  %v4069_v48 = vrot.slane %v4736_v44, 3  ;;  %v4105_v49 = vrot.slane %v4736_v44, 4 }
 0x38e   : > { %v4141_v50 = vrot.slane %v4736_v44, 5  ;;  %v4177_v51 = vrot.slane %v4736_v44, 6  ;;  %v4213_v52 = vrot.slane %v4736_v44, 7  ;;  %v3690_v53 = vrot.slane %v2410_v45, 1 }
 0x38f   : > { %v3727_v38 = vrot.slane %v2410_v45, 2  ;;  %v3764_v54 = vrot.slane %v2410_v45, 3  ;;  %v3801_v55 = vrot.slane %v2410_v45, 4  ;;  %v3838_v56 = vrot.slane %v2410_v45, 5 }
 0x390   : > { %v3875_v57 = vrot.slane %v2410_v45, 6  ;;  %v3912_v58 = vrot.slane %v2410_v45, 7 }
 0x39c   : > { %v4741_v59 = vpop.f32.mrb[18].mxu0 }
 0x39d   : > { %v3957_v60 = vrot.slane %v4741_v59, 7  ;;  %v4034_v61 = vrot.slane %v4741_v59, 1  ;;  %v4070_v62 = vrot.slane %v4741_v59, 2  ;;  %v4106_v63 = vrot.slane %v4741_v59, 3  ;;  %v2491_v1 = vpop.f32.mrb[19].mxu0 }
 0x39e   : > { %v4142_v41 = vrot.slane %v4741_v59, 4  ;;  %v4178_v2 = vrot.slane %v4741_v59, 5  ;;  %v4214_v3 = vrot.slane %v4741_v59, 6  ;;  %v3642_v4 = vrot.slane %v2491_v1, 7 }
 0x39f   : > { %v3728_v5 = vrot.slane %v2491_v1, 1  ;;  %v3765_v6 = vrot.slane %v2491_v1, 2  ;;  %v3802_v7 = vrot.slane %v2491_v1, 3  ;;  %v3839_v8 = vrot.slane %v2491_v1, 4 }
 0x3a0   : > { %v3876_v11 = vrot.slane %v2491_v1, 5  ;;  %v3913_v9 = vrot.slane %v2491_v1, 6  ;;  %v4215_v0 = vsel %vm3643_vm4, %v4214_v3, %v4213_v52  ;;  %v3998_v10 = vsel %vm3643_vm4, %v4741_v59, %v3997_v46 }
 0x3a1   : > { %v4035_v12 = vsel %vm3643_vm4, %v4034_v61, %v4033_v47  ;;  %v3691_v13 = vsel %vm3643_vm4, %v2491_v1, %v3690_v53  ;;  %v4071_v14 = vsel %vm3643_vm4, %v4070_v62, %v4069_v48  ;;  %v3729_v15 = vsel %vm3643_vm4, %v3728_v5, %v3727_v38 }
 0x3a2   : > { %v3914_v16 = vsel %vm3643_vm4, %v3913_v9, %v3912_v58  ;;  %v4107_v17 = vsel %vm3643_vm4, %v4106_v63, %v4105_v49  ;;  %v4143_v18 = vsel %vm3643_vm4, %v4142_v41, %v4141_v50  ;;  %v4179_v19 = vsel %vm3643_vm4, %v4178_v2, %v4177_v51 }
 0x3a3   : > { %v3766_v20 = vsel %vm3643_vm4, %v3765_v6, %v3764_v54  ;;  %v3803_v21 = vsel %vm3643_vm4, %v3802_v7, %v3801_v55  ;;  %v3840_v22 = vsel %vm3643_vm4, %v3839_v8, %v3838_v56  ;;  %v3877_v23 = vsel %vm3643_vm4, %v3876_v11, %v3875_v57 }
 0x3a4   : > { %v3958_v24 = vsel %vm3643_vm4, %v3957_v60, %v4736_v44  ;;  %v3644_v25 = vsel %vm3643_vm4, %v3642_v4, %v2410_v45 }
 0x3a8   : > { %v4746_v26 = vpop.f32.mrb[18].mxu1 }
 0x3a9   : > { %v3959_v27 = vrot.slane %v4746_v26, 6  ;;  %v2572_v28 = vpop.f32.mrb[19].mxu1  ;;  %v4216_v29 = vrot.slane %v4746_v26, 5  ;;  %v3999_v30 = vrot.slane %v4746_v26, 7  ;;  %v4036_v31 = vsel %vm3646_vm5, %v4746_v26, %v4035_v12 }
 0x3aa   : > { %v3645_v32 = vrot.slane %v2572_v28, 6  ;;  %v3915_v33 = vrot.slane %v2572_v28, 5  ;;  %v3692_v34 = vrot.slane %v2572_v28, 7  ;;  %v4072_v35 = vrot.slane %v4746_v26, 1 }
 0x3ab   : > { %v4217_v36 = vsel %vm3646_vm5, %v4216_v29, %v4215_v0  ;;  %v4000_v37 = vsel %vm3646_vm5, %v3999_v30, %v3998_v10  ;;  %v3730_v39 = vsel %vm3646_vm5, %v2572_v28, %v3729_v15  ;;  %v4108_v40 = vrot.slane %v4746_v26, 2 }
 0x3ac   : > { %v3916_v42 = vsel %vm3646_vm5, %v3915_v33, %v3914_v16  ;;  %v3693_v43 = vsel %vm3646_vm5, %v3692_v34, %v3691_v13  ;;  %v4073_v44 = vsel %vm3646_vm5, %v4072_v35, %v4071_v14  ;;  %v4144_v45 = vrot.slane %v4746_v26, 3 }
 0x3ad   : > { %v4109_v46 = vsel %vm3646_vm5, %v4108_v40, %v4107_v17  ;;  %v4180_v47 = vrot.slane %v4746_v26, 4  ;;  %v3767_v48 = vrot.slane %v2572_v28, 1  ;;  %v3804_v49 = vrot.slane %v2572_v28, 2 }
 0x3ae   : > { %v4145_v50 = vsel %vm3646_vm5, %v4144_v45, %v4143_v18  ;;  %v3841_v51 = vrot.slane %v2572_v28, 3  ;;  %v3878_v52 = vrot.slane %v2572_v28, 4  ;;  %v5653_v53 = vsel %vm3646_vm5, %v3959_v27, %v3958_v24 }
 0x3af   : > { %v4181_v38 = vsel %vm3646_vm5, %v4180_v47, %v4179_v19  ;;  %v3768_v54 = vsel %vm3646_vm5, %v3767_v48, %v3766_v20  ;;  %v3805_v55 = vsel %vm3646_vm5, %v3804_v49, %v3803_v21  ;;  %v5659_v56 = vsel %vm3646_vm5, %v3645_v32, %v3644_v25 }
 0x3b0   : > { %v3842_v57 = vsel %vm3646_vm5, %v3841_v51, %v3840_v22  ;;  %v3879_v58 = vsel %vm3646_vm5, %v3878_v52, %v3877_v23 }
 0x3b5   : > { %v5663_v59 = vpop.f32.mrb[20].mxu1 }
 0x3b6   : > { %v5665_v60 = vpop.f32.mrb[21].mxu1  ;;  %v4220_v61 = vrot.slane %v5663_v59, 3  ;;  %v4003_v62 = vrot.slane %v5663_v59, 5  ;;  %v4039_v1 = vrot.slane %v5663_v59, 6  ;;  %v4075_v2 = vrot.slane %v5663_v59, 7 }
 0x3b7   : > { %v3919_v63 = vrot.slane %v5665_v60, 3  ;;  %v3696_v41 = vrot.slane %v5665_v60, 5  ;;  %v3733_v3 = vrot.slane %v5665_v60, 6  ;;  %v4148_v4 = vrot.slane %v5663_v59, 1 }
 0x3b8   : > { %v4184_v5 = vrot.slane %v5663_v59, 2  ;;  %v3770_v6 = vrot.slane %v5665_v60, 7  ;;  %v3845_v8 = vrot.slane %v5665_v60, 1  ;;  %v3882_v11 = vrot.slane %v5665_v60, 2 }
 0x3b9   : > { %v3963_v9 = vrot.slane %v5663_v59, 4  ;;  %v3651_v0 = vrot.slane %v5665_v60, 4 }
 0x3c4   : > { %v4751_v7 = vpop.f32.mrb[20].mxu0 }
 0x3c5   : > { %v2653_v10 = vpop.f32.mrb[21].mxu0  ;;  %v4218_v12 = vrot.slane %v4751_v7, 4  ;;  %v4001_v13 = vrot.slane %v4751_v7, 6  ;;  %v4037_v14 = vrot.slane %v4751_v7, 7  ;;  %v4074_v15 = vsel %vm3649_vm6, %v4751_v7, %v4073_v44 }
 0x3c6   : > { %v3917_v16 = vrot.slane %v2653_v10, 4  ;;  %v3694_v17 = vrot.slane %v2653_v10, 6  ;;  %v4076_v18 = vsel %vm3652_vm7, %v4075_v2, %v4074_v15  ;;  %v3731_v19 = vrot.slane %v2653_v10, 7 }
 0x3c7   : > { %v4219_v20 = vsel %vm3649_vm6, %v4218_v12, %v4217_v36  ;;  %v4002_v21 = vsel %vm3649_vm6, %v4001_v13, %v4000_v37  ;;  %v4038_v22 = vsel %vm3649_vm6, %v4037_v14, %v4036_v31  ;;  %v4110_v23 = vrot.slane %v4751_v7, 1 }
 0x3c8   : > { %v4221_v24 = vsel %vm3652_vm7, %v4220_v61, %v4219_v20  ;;  %v4004_v25 = vsel %vm3652_vm7, %v4003_v62, %v4002_v21  ;;  %v3918_v26 = vsel %vm3649_vm6, %v3917_v16, %v3916_v42  ;;  %v4040_v27 = vsel %vm3652_vm7, %v4039_v1, %v4038_v22 }
 0x3c9   : > { %v3920_v28 = vsel %vm3652_vm7, %v3919_v63, %v3918_v26  ;;  %v3695_v29 = vsel %vm3649_vm6, %v3694_v17, %v3693_v43  ;;  %v3732_v30 = vsel %vm3649_vm6, %v3731_v19, %v3730_v39  ;;  %v4111_v32 = vsel %vm3649_vm6, %v4110_v23, %v4109_v46 }
 0x3ca   : > { %v3697_v33 = vsel %vm3652_vm7, %v3696_v41, %v3695_v29  ;;  %v3734_v31 = vsel %vm3652_vm7, %v3733_v3, %v3732_v30  ;;  %v4112_v34 = vsel %vm3652_vm7, %v5663_v59, %v4111_v32  ;;  %v4146_v35 = vrot.slane %v4751_v7, 2 }
 0x3cb   : > { %v4182_v36 = vrot.slane %v4751_v7, 3  ;;  %v3769_v37 = vsel %vm3649_vm6, %v2653_v10, %v3768_v54  ;;  %v3806_v40 = vrot.slane %v2653_v10, 1  ;;  %v3843_v42 = vrot.slane %v2653_v10, 2 }
 0x3cc   : > { %v4147_v44 = vsel %vm3649_vm6, %v4146_v35, %v4145_v50  ;;  %v3771_v43 = vsel %vm3652_vm7, %v3770_v6, %v3769_v37  ;;  %v3880_v39 = vrot.slane %v2653_v10, 3  ;;  %v3961_v45 = vrot.slane %v4751_v7, 5 }
 0x3cd   : > { %v4149_v46 = vsel %vm3652_vm7, %v4148_v4, %v4147_v44  ;;  %v4183_v47 = vsel %vm3649_vm6, %v4182_v36, %v4181_v38  ;;  %v3807_v48 = vsel %vm3649_vm6, %v3806_v40, %v3805_v55  ;;  %v3844_v49 = vsel %vm3649_vm6, %v3843_v42, %v3842_v57 }
 0x3ce   : > { %v4185_v51 = vsel %vm3652_vm7, %v4184_v5, %v4183_v47  ;;  %v3808_v52 = vsel %vm3652_vm7, %v5665_v60, %v3807_v48  ;;  %v3846_v54 = vsel %vm3652_vm7, %v3845_v8, %v3844_v49  ;;  %v3881_v50 = vsel %vm3649_vm6, %v3880_v39, %v3879_v58 }
 0x3cf   : > { %v3883_v59 = vsel %vm3652_vm7, %v3882_v11, %v3881_v50  ;;  %v3962_v61 = vsel %vm3649_vm6, %v3961_v45, %v5653_v53  ;;  %v3648_v62 = vrot.slane %v2653_v10, 5 }
 0x3d0   : > { %v3964_v38 = vsel %vm3652_vm7, %v3963_v9, %v3962_v61 }
 0x3d1   : > { %v3650_v55 = vsel %vm3649_vm6, %v3648_v62, %v5659_v56 }
 0x3d2   : > { %v3653_v57 = vsel %vm3652_vm7, %v3651_v0, %v3650_v55 }
 0x3d4   : > { %v4761_v63 = vpop.f32.mrb[22].mxu0 }
 0x3d5   : > { %v2815_v60 = vpop.f32.mrb[23].mxu0  ;;  %v4222_v1 = vrot.slane %v4761_v63, 2  ;;  %v4005_v41 = vrot.slane %v4761_v63, 4  ;;  %v4041_v2 = vrot.slane %v4761_v63, 5  ;;  %v4077_v58 = vrot.slane %v4761_v63, 6 }
 0x3d6   : > { %v3921_v3 = vrot.slane %v2815_v60, 2  ;;  %v3698_v4 = vrot.slane %v2815_v60, 4  ;;  %v3735_v5 = vrot.slane %v2815_v60, 5  ;;  %v4113_v6 = vrot.slane %v4761_v63, 7 }
 0x3d7   : > { %v4223_v53 = vsel %vm3655_vm8, %v4222_v1, %v4221_v24  ;;  %v4006_v7 = vsel %vm3655_vm8, %v4005_v41, %v4004_v25  ;;  %v4042_v8 = vsel %vm3655_vm8, %v4041_v2, %v4040_v27  ;;  %v4078_v56 = vsel %vm3655_vm8, %v4077_v58, %v4076_v18 }
 0x3d8   : > { %v3922_v11 = vsel %vm3655_vm8, %v3921_v3, %v3920_v28  ;;  %v3699_v9 = vsel %vm3655_vm8, %v3698_v4, %v3697_v33  ;;  %v3736_v0 = vsel %vm3655_vm8, %v3735_v5, %v3734_v31  ;;  %v4114_v10 = vsel %vm3655_vm8, %v4113_v6, %v4112_v34 }
 0x3d9   : > { %v4150_v12 = vsel %vm3655_vm8, %v4761_v63, %v4149_v46  ;;  %v4186_v13 = vrot.slane %v4761_v63, 1  ;;  %v3772_v14 = vrot.slane %v2815_v60, 6  ;;  %v3809_v15 = vrot.slane %v2815_v60, 7 }
 0x3da   : > { %v5727_v16 = vsel %vm3655_vm8, %v2815_v60, %v3846_v54  ;;  %v3884_v17 = vrot.slane %v2815_v60, 1  ;;  %v3965_v19 = vrot.slane %v4761_v63, 3  ;;  %v3654_v20 = vrot.slane %v2815_v60, 3 }
 0x3db   : > { %v4187_v18 = vsel %vm3655_vm8, %v4186_v13, %v4185_v51  ;;  %v3773_v21 = vsel %vm3655_vm8, %v3772_v14, %v3771_v43  ;;  %v3810_v22 = vsel %vm3655_vm8, %v3809_v15, %v3808_v52 }
 0x3dc   : > { %v3885_v23 = vsel %vm3655_vm8, %v3884_v17, %v3883_v59  ;;  %v5734_v24 = vsel %vm3655_vm8, %v3965_v19, %v3964_v38  ;;  %v5737_v25 = vsel %vm3655_vm8, %v3654_v20, %v3653_v57 }
 0x3e0   : > { %v5739_v26 = vpop.f32.mrb[22].mxu1 }
 0x3e1   : > { %v5741_v27 = vpop.f32.mrb[23].mxu1  ;;  %v4224_v28 = vrot.slane %v5739_v26, 1  ;;  %v4007_v29 = vrot.slane %v5739_v26, 3  ;;  %v4043_v30 = vrot.slane %v5739_v26, 4  ;;  %v4079_v32 = vrot.slane %v5739_v26, 5 }
 0x3e2   : > { %v3923_v33 = vrot.slane %v5741_v27, 1  ;;  %v3700_v31 = vrot.slane %v5741_v27, 3  ;;  %v3737_v34 = vrot.slane %v5741_v27, 4  ;;  %v4115_v35 = vrot.slane %v5739_v26, 6 }
 0x3e3   : > { %v4225_v36 = vsel %vm3658_vm9, %v4224_v28, %v4223_v53  ;;  %v5753_v37 = vsel %vm3658_vm9, %v4007_v29, %v4006_v7  ;;  %v5756_v40 = vsel %vm3658_vm9, %v4043_v30, %v4042_v8  ;;  %v5759_v42 = vsel %vm3658_vm9, %v4079_v32, %v4078_v56 }
 0x3e4   : > { %v5761_v44 = vpop.f32.mrb[24].mxu1  ;;  %v3924_v43 = vsel %vm3658_vm9, %v3923_v33, %v3922_v11  ;;  %v5765_v39 = vsel %vm3658_vm9, %v3700_v31, %v3699_v9  ;;  %v5768_v45 = vsel %vm3658_vm9, %v3737_v34, %v3736_v0  ;;  %v5771_v46 = vsel %vm3658_vm9, %v4115_v35, %v4114_v10 }
 0x3e5   : > { %v5773_v47 = vpop.f32.mrb[25].mxu1  ;;  %v4015_v48 = vrot.slane %v5761_v44, 1  ;;  %v4051_v49 = vrot.slane %v5761_v44, 2  ;;  %v4087_v51 = vrot.slane %v5761_v44, 3  ;;  %v4123_v52 = vrot.slane %v5761_v44, 4 }
 0x3e6   : > { %v4159_v54 = vrot.slane %v5761_v44, 5  ;;  %v4195_v50 = vrot.slane %v5761_v44, 6  ;;  %v3709_v61 = vrot.slane %v5773_v47, 1  ;;  %v4151_v38 = vrot.slane %v5739_v26, 7 }
 0x3e7   : > { %v5788_v55 = vsel %vm3658_vm9, %v5739_v26, %v4187_v18  ;;  %v3746_v57 = vrot.slane %v5773_v47, 2  ;;  %v3774_v41 = vrot.slane %v5741_v27, 5  ;;  %v3811_v4 = vrot.slane %v5741_v27, 6 }
 0x3e8   : > { %v5783_v62 = vpop.f32.mrb[26].mxu1  ;;  %v5799_v3 = vsel %vm3658_vm9, %v4151_v38, %v4150_v12  ;;  %v3848_v53 = vrot.slane %v5741_v27, 7  ;;  %v5809_v7 = vsel %vm3658_vm9, %v5741_v27, %v3885_v23 }
 0x3e9   : > { %v5793_v1 = vpop.f32.mrb[27].mxu1  ;;  %v5804_v6 = vsel %vm3658_vm9, %v3774_v41, %v3773_v21  ;;  %v4017_v56 = vrot.slane %v5783_v62, 7  ;;  %v4090_v11 = vrot.slane %v5783_v62, 1  ;;  %v5816_v9 = vsel %vm3658_vm9, %v3811_v4, %v3810_v22 }
 0x3ea   : > { %v4126_v0 = vrot.slane %v5783_v62, 2  ;;  %v5823_v12 = vsel %vm3658_vm9, %v3848_v53, %v5727_v16  ;;  %v4198_v13 = vrot.slane %v5783_v62, 4  ;;  %v3711_v14 = vrot.slane %v5793_v1, 7 }
 0x3eb   : > { %v4162_v15 = vrot.slane %v5783_v62, 3 }
 0x3ec   : > { %v5811_v8 = vpop.f32.mrb[28].mxu1 }
 0x3ed   : > { %v5819_v10 = vpop.f32.mrb[29].mxu1  ;;  %v4021_v17 = vrot.slane %v5811_v8, 5  ;;  %v4057_v19 = vrot.slane %v5811_v8, 6  ;;  %v4093_v20 = vrot.slane %v5811_v8, 7  ;;  %v4202_v21 = vrot.slane %v5811_v8, 2 }
 0x3ee   : > { %v3715_v22 = vrot.slane %v5819_v10, 5 }
 0x3f0   : > { %v5836_v28 = vpop.f32.mrb[24].mxu0 }
 0x3f1   : > { %v5842_v31 = vpop.f32.mrb[25].mxu0  ;;  %v5844_v34 = vpop.f32.mrb[30].mxu1  ;;  %v4226_v35 = vsel %vm3661_vm10, %v5836_v28, %v4225_v36  ;;  %v4009_v38 = vrot.slane %v5836_v28, 2  ;;  %v4045_v41 = vrot.slane %v5836_v28, 3  ;;  %v4081_v4 = vrot.slane %v5836_v28, 4 }
 0x3f2   : > { %4227 = vrot.lane.b32.xlu0 %v4226_v35, %s4965_s20  ;;  %v5852_v53 = vpop.f32.mrb[31].mxu1  ;;  %v3925_v59 = vsel %vm3661_vm10, %v5842_v31, %v3924_v43  ;;  %v3702_v5 = vrot.slane %v5842_v31, 2  ;;  %v3739_v60 = vrot.slane %v5842_v31, 3  ;;  %v4117_v33 = vrot.slane %v5836_v28, 5 }
 0x3f3   : > { %v4010_v36 = vsel %vm3661_vm10, %v4009_v38, %v5753_v37  ;;  %v4046_v58 = vsel %vm3661_vm10, %v4045_v41, %v5756_v40  ;;  %v4082_v35 = vsel %vm3661_vm10, %v4081_v4, %v5759_v42  ;;  %v4153_v41 = vrot.slane %v5836_v28, 6 }
 0x3f4   : > { %4011 = vrot.lane.b32.xlu1 %v4010_v36, %s4973_s21  ;;  %v5867_v43 = vpop.f32.mrb[26].mxu0  ;;  %v3703_v29 = vsel %vm3661_vm10, %v3702_v5, %v5765_v39  ;;  %v3740_v30 = vsel %vm3661_vm10, %v3739_v60, %v5768_v45  ;;  %v4118_v37 = vsel %vm3661_vm10, %v4117_v33, %v5771_v46  ;;  %v4025_v4 = vrot.slane %v5844_v34, 3 }
 0x3f5   : > { %v5876_v38 = vpop.f32.mrb[32].mxu1  ;;  %v5878_v42 = vpop.f32.mrb[27].mxu0  ;;  %v4052_v5 = vrot.slane %v5867_v43, 1  ;;  %v4088_v45 = vrot.slane %v5867_v43, 2  ;;  %v4124_v46 = vrot.slane %v5867_v43, 3  ;;  %v4160_v60 = vrot.slane %v5867_v43, 4 }
 0x3f6   : > { %v5888_v33 = vpop.f32.mrb[33].mxu1  ;;  %3926 = vrot.lane.b32.xlu0 %v3925_v59, %s4965_s20  ;;  %v4196_v40 = vrot.slane %v5867_v43, 5  ;;  %v4154_v32 = vsel %vm3661_vm10, %v4153_v41, %v5799_v3  ;;  %v4016_v63 = vsel %vm3643_vm4, %v5867_v43, %v4015_v48  ;;  %v4189_v2 = vrot.slane %v5836_v28, 7 }
 0x3f7   : > { %v4053_v23 = vsel %vm3643_vm4, %v4052_v5, %v4051_v49  ;;  %v4061_v41 = vrot.slane %v5844_v34, 4  ;;  %v3776_v36 = vrot.slane %v5842_v31, 4 }
 0x3f8   : > { %4047 = vrot.lane.b32.xlu1 %v4046_v58, %s4974_s24  ;;  %v5900_v59 = vpop.f32.mrb[28].mxu0  ;;  %v4018_v58 = vsel %vm3646_vm5, %v4017_v56, %v4016_v63  ;;  %v4190_v18 = vsel %vm3661_vm10, %v4189_v2, %v5788_v55  ;;  %v4089_v55 = vsel %vm3643_vm4, %v4088_v45, %v4087_v51  ;;  %v4097_v2 = vrot.slane %v5844_v34, 5 }
 0x3f9   : > { %v5902_v16 = vpop.f32.mrb[29].mxu0  ;;  %v4019_v39 = vrot.slane %v5900_v59, 6  ;;  %v4055_v3 = vrot.slane %v5900_v59, 7  ;;  %v4091_v51 = vsel %vm3646_vm5, %v4090_v11, %v4089_v55  ;;  %v4128_v55 = vrot.slane %v5900_v59, 1 }
 0x3fa   : > { %3704 = vrot.lane.b32.xlu0 %v3703_v29, %s4973_s21  ;;  %v4054_v29 = vsel %vm3646_vm5, %v5783_v62, %v4053_v23 }
 0x3fb   : > { %v4020_v48 = vsel %vm3649_vm6, %v4019_v39, %v4018_v58  ;;  %v4056_v56 = vsel %vm3649_vm6, %v4055_v3, %v4054_v29  ;;  %v3813_v58 = vrot.slane %v5842_v31, 5 }
 0x3fc   : > { %4083 = vrot.lane.b32.xlu1 %v4082_v35, %s4975_s11  ;;  %v5928_v63 = vpop.f32.mrb[30].mxu0  ;;  %v4022_v49 = vsel %vm3652_vm7, %v4021_v17, %v4020_v48  ;;  %v4058_v35 = vsel %vm3652_vm7, %v4057_v19, %v4056_v56  ;;  %v5947_v17 = vsel %vm3661_vm10, %v3776_v36, %v5804_v6  ;;  %v4125_v19 = vsel %vm3643_vm4, %v4124_v46, %v4123_v52 }
 0x3fd   : > { %v5938_v23 = vpop.f32.mrb[31].mxu0  ;;  %v4023_v39 = vrot.slane %v5928_v63, 4  ;;  %v4059_v5 = vrot.slane %v5928_v63, 5  ;;  %v4095_v45 = vrot.slane %v5928_v63, 6  ;;  %v4092_v6 = vsel %vm3649_vm6, %v5900_v59, %v4091_v51 }
 0x3fe   : > { %3741 = vrot.lane.b32.xlu0 %v3740_v30, %s4974_s24  ;;  %v4127_v30 = vsel %vm3646_vm5, %v4126_v0, %v4125_v19  ;;  %v4094_v46 = vsel %vm3652_vm7, %v4093_v20, %v4092_v6  ;;  %v5975_v29 = vsel %vm3661_vm10, %v3813_v58, %v5816_v9  ;;  %v4131_v20 = vrot.slane %v5928_v63, 7 }
 0x3ff   : > { %v4024_v3 = vsel %vm3655_vm8, %v4023_v39, %v4022_v49  ;;  %v4060_v48 = vsel %vm3655_vm8, %v4059_v5, %v4058_v35  ;;  %v4096_v56 = vsel %vm3655_vm8, %v4095_v45, %v4094_v46  ;;  %v4133_v39 = vrot.slane %v5844_v34, 6 }
 0x400   : > { %4119 = vrot.lane.b32.xlu1 %v4118_v37, %s4976_s12  ;;  %v5966_v11 = vpop.f32.mrb[32].mxu0  ;;  %v4026_v36 = vsel %vm3658_vm9, %v4025_v4, %v4024_v3  ;;  %v4062_v52 = vsel %vm3658_vm9, %v4061_v41, %v4060_v48  ;;  %v4098_v41 = vsel %vm3658_vm9, %v4097_v2, %v4096_v56  ;;  %v4129_v2 = vsel %vm3649_vm6, %v4128_v55, %v4127_v30 }
 0x401   : > { %v5977_v49 = vpop.f32.mrb[33].mxu0  ;;  %v4027_v0 = vrot.slane %v5966_v11, 2  ;;  %v4063_v37 = vrot.slane %v5966_v11, 3  ;;  %v4099_v4 = vrot.slane %v5966_v11, 4  ;;  %v4135_v51 = vrot.slane %v5966_v11, 5 }
 0x402   : > { %v3850_v45 = vrot.slane %v5842_v31, 6  ;;  %v4197_v58 = vsel %vm3643_vm4, %v4196_v40, %v4195_v50  ;;  %v4200_v19 = vrot.slane %v5900_v59, 3  ;;  %v4130_v3 = vsel %vm3652_vm7, %v5811_v8, %v4129_v2 }
 0x403   : > { %v4028_v9 = vsel %vm3661_vm10, %v4027_v0, %v4026_v36  ;;  %v4064_v35 = vsel %vm3661_vm10, %v4063_v37, %v4062_v52  ;;  %v4100_v5 = vsel %vm3661_vm10, %v4099_v4, %v4098_v41  ;;  %v4204_v48 = vrot.slane %v5928_v63, 1 }
 0x404   : > { %4155 = vrot.lane.b32.xlu1 %v4154_v32, %s4969_s25  ;;  %4029 = vrot.lane.b32.xlu0 %v4028_v9, %s4973_s21  ;;  %v4199_v32 = vsel %vm3646_vm5, %v4198_v13, %v4197_v58  ;;  %v4207_v6 = vrot.slane %v5966_v11, 7  ;;  %v4132_v30 = vsel %vm3655_vm8, %v4131_v20, %v4130_v3  ;;  %v3851_v36 = vsel %vm3661_vm10, %v3850_v45, %v5823_v12 }
 0x405   : > { %v4201_v50 = vsel %vm3649_vm6, %v4200_v19, %v4199_v32  ;;  %v3887_v40 = vrot.slane %v5842_v31, 7  ;;  %v4134_v52 = vsel %vm3658_vm9, %v4133_v39, %v4132_v30  ;;  %v3710_v13 = vsel %vm3643_vm4, %v5878_v42, %v3709_v61 }
 0x406   : > { %v4203_v46 = vsel %vm3652_vm7, %v4202_v21, %v4201_v50  ;;  %v3713_v0 = vrot.slane %v5902_v16, 6  ;;  %v4136_v12 = vsel %vm3661_vm10, %v4135_v51, %v4134_v52  ;;  %v3717_v21 = vrot.slane %v5938_v23, 4 }
 0x407   : > { %v4205_v37 = vsel %vm3655_vm8, %v4204_v48, %v4203_v46  ;;  %v6028_v56 = vsel %vm3661_vm10, %v3887_v40, %v5809_v7  ;;  %v3712_v61 = vsel %vm3646_vm5, %v3711_v14, %v3710_v13  ;;  %v3721_v41 = vrot.slane %v5977_v49, 2 }
 0x408   : > { %4191 = vrot.lane.b32.xlu1 %v4190_v18, %s4967_s22  ;;  %4065 = vrot.lane.b32.xlu0 %v4064_v35, %s4974_s24  ;;  %v4206_v4 = vsel %vm3658_vm9, %v5844_v34, %v4205_v37  ;;  %v3719_v18 = vrot.slane %v5852_v53, 3  ;;  %v3714_v20 = vsel %vm3649_vm6, %v3713_v0, %v3712_v61  ;;  %v4161_v7 = vsel %vm3643_vm4, %v4160_v60, %v4159_v54 }
 0x409   : > { %v4208_v55 = vsel %vm3661_vm10, %v4207_v6, %v4206_v4  ;;  %v4164_v39 = vrot.slane %v5900_v59, 2  ;;  %v3716_v14 = vsel %vm3652_vm7, %v3715_v22, %v3714_v20  ;;  %v4163_v9 = vsel %vm3646_vm5, %v4162_v15, %v4161_v7 }
 0x40a   : > { %v4169_v35 = vrot.slane %v5844_v34, 7  ;;  %v4171_v51 = vrot.slane %v5966_v11, 6  ;;  %v3718_v54 = vsel %vm3655_vm8, %v3717_v21, %v3716_v14  ;;  %v6354_v22 = vrot.slane %v5878_v42, 1 }
 0x40b   : > { %v4165_v60 = vsel %vm3649_vm6, %v4164_v39, %v4163_v9  ;;  %v3750_v15 = vrot.slane %v5902_v16, 7  ;;  %v3720_v45 = vsel %vm3658_vm9, %v3719_v18, %v3718_v54  ;;  %v6355_v58 = vrot.slane %v5811_v8, 1 }
 0x40c   : > { %3778 = vrot.lane.b32.xlu1 %v5947_v17, %s4975_s11  ;;  %4101 = vrot.lane.b32.xlu0 %v4100_v5, %s4975_s11  ;;  %v3748_v2 = vsel %vm3643_vm4, %v6354_v22, %v3746_v57  ;;  %v3754_v19 = vrot.slane %v5938_v23, 5  ;;  %v3722_v3 = vsel %vm3661_vm10, %v3721_v41, %v3720_v45  ;;  %v3756_v48 = vrot.slane %v5852_v53, 4 }
 0x40d   : > { %v4167_v17 = vsel %vm3652_vm7, %v6355_v58, %v4165_v60  ;;  %v3749_v5 = vsel %vm3646_vm5, %v5793_v1, %v3748_v2  ;;  %v6356_v30 = vrot.slane %v5819_v10, 6  ;;  %v3758_v40 = vrot.slane %v5977_v49, 3 }
 0x40e   : > { %v4168_v32 = vsel %vm3655_vm8, %v5928_v63, %v4167_v17  ;;  %v3751_v57 = vsel %vm3649_vm6, %v3750_v15, %v3749_v5  ;;  %v6357_v52 = vrot.slane %v5773_v47, 5  ;;  %v6358_v46 = vrot.slane %v5878_v42, 4 }
 0x40f   : > { %v4170_v6 = vsel %vm3658_vm9, %v4169_v35, %v4168_v32  ;;  %v3753_v50 = vsel %vm3652_vm7, %v6356_v30, %v3751_v57  ;;  %v6359_v21 = vrot.slane %v5793_v1, 3  ;;  %v3862_v61 = vrot.slane %v5902_v16, 2 }
 0x410   : > { %v3859_v13 = vsel %vm3643_vm4, %v6358_v46, %v6357_v52  ;;  %3815 = vrot.lane.b32.xlu1 %v5975_v29, %s4976_s12  ;;  %4137 = vrot.lane.b32.xlu0 %v4136_v12, %s4976_s12  ;;  %v4172_v0 = vsel %vm3661_vm10, %v4171_v51, %v4170_v6  ;;  %v3755_v37 = vsel %vm3655_vm8, %v3754_v19, %v3753_v50  ;;  %v3867_v41 = vrot.slane %v5852_v53, 7 }
 0x411   : > { %v3861_v4 = vsel %vm3646_vm5, %v6359_v21, %v3859_v13  ;;  %v3757_v18 = vsel %vm3658_vm9, %v3756_v48, %v3755_v37  ;;  %v3869_v20 = vrot.slane %v5977_v49, 6  ;;  %v6360_v29 = vrot.slane %v5773_v47, 3 }
 0x412   : > { %v6361_v12 = vrot.slane %v5878_v42, 2  ;;  %v3759_v39 = vsel %vm3661_vm10, %v3758_v40, %v3757_v18  ;;  %v3863_v14 = vsel %vm3649_vm6, %v3862_v61, %v3861_v4  ;;  %v6362_v9 = vrot.slane %v5793_v1, 1 }
 0x413   : > { %v3791_v51 = vrot.slane %v5938_v23, 6  ;;  %v6363_v54 = vrot.slane %v5819_v10, 1  ;;  %v3793_v2 = vrot.slane %v5852_v53, 5  ;;  %v3795_v15 = vrot.slane %v5977_v49, 4 }
 0x414   : > { %v3785_v7 = vsel %vm3643_vm4, %v6361_v12, %v6360_v29  ;;  %3852 = vrot.lane.b32.xlu1 %v3851_v36, %s4969_s25  ;;  %4209 = vrot.lane.b32.xlu0 %v4208_v55, %s4967_s22  ;;  %v6364_v58 = vrot.slane %v5819_v10, 7  ;;  %v6365_v5 = vrot.slane %v5773_v47, 6  ;;  %v6366_v19 = vrot.slane %v5878_v42, 5 }
 0x415   : > { %v3787_v35 = vsel %vm3646_vm5, %v6362_v9, %v3785_v7  ;;  %v3865_v60 = vsel %vm3652_vm7, %v6363_v54, %v3863_v14  ;;  %v3899_v57 = vrot.slane %v5902_v16, 3  ;;  %v6367_v55 = vrot.slane %v5793_v1, 4 }
 0x416   : > { %v3788_v22 = vsel %vm3649_vm6, %v5902_v16, %v3787_v35  ;;  %v3866_v45 = vsel %vm3655_vm8, %v5938_v23, %v3865_v60  ;;  %v3896_v32 = vsel %vm3643_vm4, %v6366_v19, %v6365_v5  ;;  %v3903_v30 = vrot.slane %v5938_v23, 1 }
 0x417   : > { %v3790_v17 = vsel %vm3652_vm7, %v6364_v58, %v3788_v22  ;;  %v3868_v48 = vsel %vm3658_vm9, %v3867_v41, %v3866_v45  ;;  %v3898_v6 = vsel %vm3646_vm5, %v6367_v55, %v3896_v32  ;;  %v3906_v46 = vrot.slane %v5977_v49, 7 }
 0x418   : > { %v3792_v36 = vsel %vm3655_vm8, %v3791_v51, %v3790_v17  ;;  %v3870_v50 = vsel %vm3661_vm10, %v3869_v20, %v3868_v48  ;;  %v3900_v52 = vsel %vm3649_vm6, %v3899_v57, %v3898_v6  ;;  %v6368_v37 = vrot.slane %v5819_v10, 2  ;;  %3889 = vrot.lane.b32.xlu1 %v6028_v56, %s4967_s22  ;;  %3723 = vrot.lane.b32.xlu0 %v3722_v3, %s4973_s21 }
 0x419   : > { %v3794_v40 = vsel %vm3658_vm9, %v3793_v2, %v3792_v36  ;;  %v6369_v4 = vrot.slane %v5773_v47, 4  ;;  %v6370_v61 = vrot.slane %v5878_v42, 3  ;;  %v3825_v41 = vrot.slane %v5902_v16, 1 }
 0x41a   : > { %v3796_v13 = vsel %vm3661_vm10, %v3795_v15, %v3794_v40  ;;  %v3902_v21 = vsel %vm3652_vm7, %v6368_v37, %v3900_v52  ;;  %v6371_v29 = vrot.slane %v5793_v1, 2  ;;  %v3828_v7 = vrot.slane %v5938_v23, 7 }
 0x41b   : > { %v3822_v18 = vsel %vm3643_vm4, %v6370_v61, %v6369_v4  ;;  %v3904_v20 = vsel %vm3655_vm8, %v3903_v30, %v3902_v21  ;;  %v3830_v14 = vrot.slane %v5852_v53, 6  ;;  %v3832_v56 = vrot.slane %v5977_v49, 5 }
 0x41c   : > { %v3824_v12 = vsel %vm3646_vm5, %v6371_v29, %v3822_v18  ;;  %v3905_v9 = vsel %vm3658_vm9, %v5852_v53, %v3904_v20  ;;  %v6372_v3 = vrot.slane %v5773_v47, 7  ;;  %v6373_v51 = vrot.slane %v5878_v42, 6  ;;  %4173 = vrot.lane.b32.xlu1 %v4172_v0, %s4969_s25  ;;  %3760 = vrot.lane.b32.xlu0 %v3759_v39, %s4974_s24  ;;  %s4977_s24 = smov [#allocation5]  }
 0x41d   : > { %v3826_v35 = vsel %vm3649_vm6, %v3825_v41, %v3824_v12  ;;  %v3907_v60 = vsel %vm3661_vm10, %v3906_v46, %v3905_v9  ;;  %v6374_v2 = vrot.slane %v5793_v1, 5  ;;  %v3936_v45 = vrot.slane %v5902_v16, 4 }
 0x41e   : > { %v3933_v54 = vsel %vm3643_vm4, %v6373_v51, %v6372_v3  ;;  %v3827_v22 = vsel %vm3652_vm7, %v5819_v10, %v3826_v35  ;;  %v3940_v17 = vrot.slane %v5938_v23, 2  ;;  %v3942_v5 = vrot.slane %v5852_v53, 1 }
 0x41f   : > { %v3935_v15 = vsel %vm3646_vm5, %v6374_v2, %v3933_v54  ;;  %v3829_v58 = vsel %vm3655_vm8, %v3828_v7, %v3827_v22  ;;  %v6375_v19 = vrot.slane %v5761_v44, 7  ;;  %v6376_v32 = vrot.slane %v5867_v43, 6 }
 0x420   : > { %v3831_v48 = vsel %vm3658_vm9, %v3830_v14, %v3829_v58  ;;  %v3937_v36 = vsel %vm3649_vm6, %v3936_v45, %v3935_v15  ;;  %v4234_v55 = vrot.slane %v5783_v62, 5  ;;  %v4236_v6 = vrot.slane %v5900_v59, 4  ;;  %3871 = vrot.lane.b32.xlu1 %v3870_v50, %s4969_s25  ;;  %3797 = vrot.lane.b32.xlu0 %v3796_v13, %s4975_s11  ;;  %v6257_v58 = vpop.permute.xlu0 %4254  ;;  %s4547_s25 = sshll.u32 %s4953_s30, 8  ;;  %s4887_s11 = sshll.u32 %s4977_s24, 4  ;;  %s4888_s11 = int_to_ptr.vmem [resolvable:$false] %s4887_s11 }
 0x421   : > { %v4233_v57 = vsel %vm3643_vm4, %v6376_v32, %v6375_v19  ;;  %v3833_v30 = vsel %vm3661_vm10, %v3832_v56, %v3831_v48  ;;  %v6377_v40 = vrot.slane %v5819_v10, 3  ;;  %v4238_v46 = vrot.slane %v5811_v8, 3  ;;  %s6296_s26 = scalar_lea.hbm %s6351_s8, %s4547_s25 }
 0x422   : > { %v4240_v0 = vrot.slane %v5928_v63, 2  ;;  %v3981_v39 = vrot.slane %v5867_v43, 7  ;;  %v4235_v21 = vsel %vm3646_vm5, %v4234_v55, %v4233_v57  ;;  %v4242_v4 = vrot.slane %v5844_v34, 1 }
 0x423   : > { %v3939_v52 = vsel %vm3652_vm7, %v6377_v40, %v3937_v36  ;;  %v4237_v18 = vsel %vm3649_vm6, %v4236_v6, %v4235_v21  ;;  %v3967_v41 = vrot.slane %v5739_v26, 2  ;;  %v3969_v20 = vrot.slane %v5836_v28, 1 }
 0x424   : > { %v3941_v37 = vsel %vm3655_vm8, %v3940_v17, %v3939_v52  ;;  %v3983_v29 = vrot.slane %v5783_v62, 6  ;;  %v4239_v12 = vsel %vm3652_vm7, %v4238_v46, %v4237_v18  ;;  %v3657_v7 = vrot.slane %v5741_v27, 2  ;;  %3908 = vrot.lane.b32.xlu1 %v3907_v60, %s4967_s22  ;;  %3834 = vrot.lane.b32.xlu0 %v3833_v30, %s4976_s12  ;;  %s4889_s12 = scalar_lea.vmem %s4888_s11, 512 }
 0x425   : > { %v3943_v61 = vsel %vm3658_vm9, %v3942_v5, %v3941_v37  ;;  %v4241_v14 = vsel %vm3655_vm8, %v4240_v0, %v4239_v12  ;;  %v3968_v26 = vsel %vm3658_vm9, %v3967_v41, %v5734_v24  ;;  %v3660_v28 = vrot.slane %v5842_v31, 1 }
 0x426   : > { %v3944_v43 = vsel %vm3661_vm10, %v5977_v49, %v3943_v61  ;;  %v3674_v62 = vrot.slane %v5878_v42, 7  ;;  %v4243_v50 = vsel %vm3658_vm9, %v4242_v4, %v4241_v14  ;;  %v3970_v13 = vsel %vm3661_vm10, %v3969_v20, %v3968_v26 }
 0x427   : > { %v3659_v9 = vsel %vm3658_vm9, %v3657_v7, %v5737_v25  ;;  %v3676_v35 = vrot.slane %v5793_v1, 6  ;;  %v4244_v27 = vsel %vm3661_vm10, %v5966_v11, %v4243_v50  ;;  %3972 = vst.msk [vmem:[#allocation3 + $0x8] sm:$0xff] %vm3664_vm11, %v3970_v13  ;;  %v3982_v31 = vsel %vm3643_vm4, %v3981_v39, %v5761_v44 }
 0x428   : > { %v3662_v24 = vsel %vm3661_vm10, %v3660_v28, %v3659_v9  ;;  %v3984_v25 = vsel %vm3646_vm5, %v3983_v29, %v3982_v31  ;;  %v3985_v1 = vrot.slane %v5900_v59, 5  ;;  %v3987_v42 = vrot.slane %v5811_v8, 4  ;;  %3945 = vrot.lane.b32.xlu1 %v3944_v43, %s4965_s20  ;;  %4245 = vrot.lane.b32.xlu0 %v4244_v27, %s4965_s20  ;;  %s334_s20 = sand.u32 1, %s4945_s28  }
 0x429   : > { %3665 = vst.msk [vmem:[#allocation3] sm:$0xff] %vm3664_vm11, %v3662_v24  ;;  %v3989_v56 = vrot.slane %v5928_v63, 3  ;;  %v3991_v3 = vrot.slane %v5844_v34, 2  ;;  %v3993_v51 = vrot.slane %v5966_v11, 1  ;;  %v3675_v54 = vsel %vm3643_vm4, %v3674_v62, %v5773_v47  ;;  %s4468_s22 = sshll.u32 %s334_s20, 4  ;;  %s4355_s30 = scalar_lea.sflag [#allocation6], %s334_s20 }
 0x42a   : > { %v3986_v44 = vsel %vm3649_vm6, %v3985_v1, %v3984_v25  ;;  %v3678_v60 = vrot.slane %v5902_v16, 5  ;;  %v3680_v22 = vrot.slane %v5819_v10, 4  ;;  %v3677_v59 = vsel %vm3646_vm5, %v3676_v35, %v3675_v54  ;;  %s336_s16 = scalar_lea.vmem [#allocation5], %s4468_s22 }
 0x42b   : > { %v3988_v2 = vsel %vm3652_vm7, %v3987_v42, %v3986_v44  ;;  %v3682_v8 = vrot.slane %v5938_v23, 3  ;;  %v3684_v63 = vrot.slane %v5852_v53, 2  ;;  %v3686_v16 = vrot.slane %v5977_v49, 1  ;;  %s4371_s19 = sshll.u32 %s336_s16, 4  ;;  %s6298_s19 = int_to_ptr.vmem [resolvable:$true] %s4371_s19 }
 0x42c   : > { %v3990_v34 = vsel %vm3655_vm8, %v3989_v56, %v3988_v2  ;;  %v3679_v47 = vsel %vm3649_vm6, %v3678_v60, %v3677_v59  ;;  %v4335_v62 = vadd.f32 %v5876_v38, %v6257_v58  ;;  %v4337_v50 = vadd.f32 %v5888_v33, %v6257_v58  ;;  %s4883_s21 = scalar_lea.vmem %s6298_s19, 256  ;;  %p4890_p1 = scmp.lt.s32.totalorder %s6298_s19, %s4888_s11 }
 0x42d   : > { %v3992_v10 = vsel %vm3658_vm9, %v3991_v3, %v3990_v34  ;;  %v3681_v11 = vsel %vm3652_vm7, %v3680_v22, %v3679_v47  ;;  %p4884_p12 = scmp.ne.s32.totalorder %s6298_s19, %s4883_s21  ;;  %p4891_p2 = scmp.lt.s32.totalorder %s4889_s12, %s4883_s21 }
 0x42e   : > { %v3994_v15 = vsel %vm3661_vm10, %v3993_v51, %v3992_v10  ;;  %v3683_v23 = vsel %vm3655_vm8, %v3682_v8, %v3681_v11 }
 0x42f   : > { %3996 = vst.msk [vmem:[#allocation4 + $0x8] sm:$0xff] %vm3664_vm11, %v3994_v15  ;;  %v3685_v53 = vsel %vm3658_vm9, %v3684_v63, %v3683_v23  ;;  %p4885_p13 = pnand %p4884_p12, %p5063_p4  ;;  %p4892_p3 = por %p4891_p2, %p4890_p1 }
 0x430   : > { %v3687_v45 = vsel %vm3661_vm10, %v3686_v16, %v3685_v53 }
 0x431   : > { %3689 = vst.msk [vmem:[#allocation4] sm:$0xff] %vm3664_vm11, %v3687_v45  ;;  %p4886_p0 = pneg %p4885_p13 }
 0x433   : > { %p4893_p5 = pnand %p4892_p3, %p4886_p0 }
 0x464   : > { %v4228_v17 = vpop.permute.xlu0 %4227 }
 0x466   : > { %v4012_v49 = vpop.permute.xlu1 %4011 }
 0x467   : > { %4014 = vst.msk [vmem:[#allocation3 + $0x8] sm:$0xff] %vm3707_vm12, %v4012_v49 }
 0x468   : > { %v3927_v5 = vpop.permute.xlu0 %3926 }
 0x46a   : > { %v4048_v19 = vpop.permute.xlu1 %4047 }
 0x46b   : > { %4050 = vst.msk [vmem:[#allocation3 + $0x8] sm:$0xff] %vm3744_vm13, %v4048_v19 }
 0x46c   : > { %v3705_v32 = vpop.permute.xlu0 %3704 }
 0x46d   : > { %3708 = vst.msk [vmem:[#allocation3] sm:$0xff] %vm3707_vm12, %v3705_v32 }
 0x46e   : > { %v4084_v57 = vpop.permute.xlu1 %4083 }
 0x46f   : > { %4086 = vst.msk [vmem:[#allocation3 + $0x8] sm:$0xff] %vm3781_vm14, %v4084_v57 }
 0x470   : > { %v3742_v48 = vpop.permute.xlu0 %3741 }
 0x471   : > { %3745 = vst.msk [vmem:[#allocation3] sm:$0xff] %vm3744_vm13, %v3742_v48 }
 0x472   : > { %v4120_v36 = vpop.permute.xlu1 %4119 }
 0x473   : > { %4122 = vst.msk [vmem:[#allocation3 + $0x8] sm:$0xff] %vm3818_vm15, %v4120_v36 }
 0x476   : > { %v4156_v55 = vpop.permute.xlu1 %4155  ;;  %v4030_v6 = vpop.permute.xlu0 %4029 }
 0x477   : > { %4158 = vst.msk [vmem:[#allocation3 + $0x8] sm:$0xff] %vm3855_vm0, %v4156_v55 }
 0x478   : > { %4032 = vst.msk [vmem:[#allocation4 + $0x8] sm:$0xff] %vm3707_vm12, %v4030_v6 }
 0x47a   : > { %v4192_v30 = vpop.permute.xlu1 %4191  ;;  %v4066_v40 = vpop.permute.xlu0 %4065 }
 0x47b   : > { %4194 = vst.msk [vmem:[#allocation3 + $0x8] sm:$0xff] %vm3892_vm1, %v4192_v30 }
 0x47c   : > { %4068 = vst.msk [vmem:[#allocation4 + $0x8] sm:$0xff] %vm3744_vm13, %v4066_v40 }
 0x47d   : > { %4230 = vst.msk [vmem:[#allocation3 + $0x8] sm:$0xff] %vm3929_vm2, %v4228_v17 }
 0x47e   : > { %v3779_v52 = vpop.permute.xlu1 %3778  ;;  %v4102_v46 = vpop.permute.xlu0 %4101 }
 0x47f   : > { %3782 = vst.msk [vmem:[#allocation3] sm:$0xff] %vm3781_vm14, %v3779_v52  ;;  %4104 = vst.msk [vmem:[#allocation4 + $0x8] sm:$0xff] %vm3781_vm14, %v4102_v46 }
 0x482   : > { %v3816_v0 = vpop.permute.xlu1 %3815  ;;  %v4138_v39 = vpop.permute.xlu0 %4137 }
 0x483   : > { %3819 = vst.msk [vmem:[#allocation3] sm:$0xff] %vm3818_vm15, %v3816_v0  ;;  %4140 = vst.msk [vmem:[#allocation4 + $0x8] sm:$0xff] %vm3818_vm15, %v4138_v39 }
 0x484   : > { %v4343_v28 = vld [vmem:[#allocation3 + $0x8] sm:$0xff] }
 0x485   : > { %v4345_v9 = vmul.f32 %v4343_v28, %v4337_v50 }
 0x486   : > { %v3853_v37 = vpop.permute.xlu1 %3852  ;;  %v4210_v21 = vpop.permute.xlu0 %4209 }
 0x487   : > { %3856 = vst.msk [vmem:[#allocation3] sm:$0xff] %vm3855_vm0, %v3853_v37 }
 0x48a   : > { %v3890_v4 = vpop.permute.xlu1 %3889  ;;  %v3724_v61 = vpop.permute.xlu0 %3723 }
 0x48b   : > { %3893 = vst.msk [vmem:[#allocation3] sm:$0xff] %vm3892_vm1, %v3890_v4 }
 0x48c   : > { %3726 = vst.msk [vmem:[#allocation4] sm:$0xff] %vm3707_vm12, %v3724_v61 }
 0x48d   : > { %3930 = vst.msk [vmem:[#allocation3] sm:$0xff] %vm3929_vm2, %v3927_v5 }
 0x48e   : > { %v4174_v18 = vpop.permute.xlu1 %4173  ;;  %v3761_v41 = vpop.permute.xlu0 %3760 }
 0x48f   : > { %4176 = vst.msk [vmem:[#allocation4 + $0x8] sm:$0xff] %vm3855_vm0, %v4174_v18 }
 0x490   : > { %3763 = vst.msk [vmem:[#allocation4] sm:$0xff] %vm3744_vm13, %v3761_v41 }
 0x491   : > { %4212 = vst.msk [vmem:[#allocation4 + $0x8] sm:$0xff] %vm3892_vm1, %v4210_v21 }
 0x492   : > { %v3872_v20 = vpop.permute.xlu1 %3871  ;;  %v3798_v29 = vpop.permute.xlu0 %3797 }
 0x493   : > { %3800 = vst.msk [vmem:[#allocation4] sm:$0xff] %vm3781_vm14, %v3798_v29 }
 0x494   : > { %v4342_v26 = vld [vmem:[#allocation3] sm:$0xff] }
 0x495   : > { %v4344_v13 = vmul.f32 %v4342_v26, %v4335_v62 }
 0x496   : > { %v3909_v43 = vpop.permute.xlu1 %3908  ;;  %v3835_v12 = vpop.permute.xlu0 %3834 }
 0x497   : > { %3837 = vst.msk [vmem:[#allocation4] sm:$0xff] %vm3818_vm15, %v3835_v12 }
 0x498   : > { %3874 = vst.msk [vmem:[#allocation4] sm:$0xff] %vm3855_vm0, %v3872_v20 }
 0x499   : > { %3911 = vst.msk [vmem:[#allocation4] sm:$0xff] %vm3892_vm1, %v3909_v43 }
 0x49a   : > { %v3946_v7 = vpop.permute.xlu1 %3945  ;;  %v4246_v14 = vpop.permute.xlu0 %4245 }
 0x49b   : > { %3948 = vst.msk [vmem:[#allocation4] sm:$0xff] %vm3929_vm2, %v3946_v7  ;;  %4248 = vst.msk [vmem:[#allocation4 + $0x8] sm:$0xff] %vm3929_vm2, %v4246_v14 }
 0x4a2   : > { %v4348_v35 = vld [vmem:[#allocation4] sm:$0xff]  ;;  %v4349_v27 = vld [vmem:[#allocation4 + $0x8] sm:$0xff] }
 0x4a3   : > { %v4350_v24 = vadd.f32 %v4348_v35, %v4344_v13  ;;  %v4351_v31 = vadd.f32 %v4349_v27, %v4345_v9 }
 0x4a5   : > { %4352 = vst [vmem:[%s336_s16] sm:$0xff] %v4350_v24  ;;  %4353 = vst [vmem:[%s336_s16 + $0x8] sm:$0xff] %v4351_v31 }
 0x4a6   : > { %4896 = shalt.err (!%p4893_p5)
}
 0x4a7   : > { %s4897_s20 = scalar_lea.hbm %s6296_s26, 256  ;;  %s4901_s16 = scalar_lea.hbm %s6351_s8, 512 }
 0x4a8   : > { %p4898_p6 = scmp.ne.s32.totalorder %s6296_s26, %s4897_s20  ;;  %p4902_p10 = scmp.lt.u32.totalorder %s6296_s26, %s6351_s8 }
 0x4a9   : > { %p4903_p11 = scmp.lt.u32.totalorder %s4901_s16, %s4897_s20  ;;  %p4905_p13 = scmp.lt.u32.totalorder %s4897_s20, %s6296_s26 }
 0x4aa   : > { %p4899_p7 = pnand %p4898_p6, %p5063_p4 }
 0x4ab   : > { %p4904_p12 = por %p4903_p11, %p4902_p10 }
 0x4ac   : > { %p4900_p9 = pneg %p4899_p7 }
 0x4ad   : > { %p4906_p0 = por %p4905_p13, %p4904_p12 }
 0x4af   : > { %p4907_p1 = pnand %p4906_p0, %p4900_p9 }
 0x4b1   : > { %4910 = shalt.err (!%p4907_p1)
}
 0x4b2   : > { %4812 = dma.vmem_to_hbm [thread:$0]  (%p5063_p4), %s6298_s19, 256, %s6296_s26, %s4355_s30  }
 0x4b3 PF: > { %p4818_p2 = scmp.ge.s32.totalorder %s4961_s10, 2  ;;  %s4383_s21 = sand.u32 1, %s4941_s27  }
 0x4b4   : > { %s4384_s24 = scalar_lea.sflag [#allocation6], %s4383_s21 }
 0x4b5   : > { %p4815_p3 = pnand %p4818_p2, %p5070_p8 }
 0x4b7   : > { %4936 = dma.done.wait (!%p4815_p3), %s4384_s24, 256  }
 0x4b8   : > { %4938 = vsyncadd (!%p4815_p3), %s4384_s24, 4294967040  ;;  %s21_s10 = sadd.s32 1, %s4961_s10   ;;  %s6378_s27 = smov %s4945_s28 }
 0x4b9   : > { %p18_p5 = scmp.ge.s32.totalorder %s21_s10, 4   ;;  %s6379_s28 = smov %s4949_s29 }
 0x4ba   : > { %s6380_s29 = smov %s5076_s18  ;;  %s6381_s30 = smov %s4957_s9 }
 0x4bb   : > { %s6382_s9 = smov %s6384_s13  ;;  %20 = sbr.rel (!%p18_p5) target bundleno = 4 (0x4), region = 96 }
 0x4c2   :  { %4389 = vsyncpa [#allocation6], 1 }
 0x4c3   :  { %4391 = vsyncpa [#allocation6 + $0x1], 1 }

</bundles_post_ra>
